<compile_context>
chip_gen: v7x
topology: tpu7x:2x2x1
jax: 0.10.0
libtpu: 0.0.40
codegen_flags: <defaults>
</compile_context>

<pallas_src>
import math
import functools

import numpy as np
import jax
import jax.numpy as jnp
from jax import lax
from jax.experimental import pallas as pl
from jax.experimental.pallas import tpu as pltpu


_LANE_TARGET = 256            # folded feature width f*m_pad (256 = MXU-native on v6e/v7x;
                              # set 128 on v5e when sweeping)
_TILE_BYTES = 2 * 1024 * 1024  # per-buffer budget for the streamed input tile (sweepable)


def _round_up(x, m):
    return ((x + m - 1) // m) * m


def _next_pow2(x):
    return 1 << (int(x) - 1).bit_length()


def _build_neg_selectors(ncluster):
    """Static selector pairs reproducing `sim[mask].reshape(N, -1)` exactly.

    Builds the PyTorch mask (fill_diagonal + the mask[i, ncluster+1] quirk), takes the
    flat row-major selection and chunks it into N rows of N-2 'negative' logits.  Each
    output row r draws from at most 3 source rows of sim, so the selection is written as
        neg[r] = sum_m sum_{a,b} U[m,r,a] * V[m,r,b] * e[a,b]
    with one-hot U[m,r,:] (source row of slot m) and 0/1 V[m,r,:] (its column set).
    Returns a (6, N, N) float32 stack [U0, U1, U2, V0, V1, V2] (O(N^2), not O(N^3))."""
    k = ncluster
    n = 2 * k
    mask = np.ones((n, n), dtype=bool)
    np.fill_diagonal(mask, False)
    for i in range(k):
        mask[i, k + 1] = False
        mask[k + 1, i] = False
    flat = np.flatnonzero(mask.reshape(-1)).reshape(n, n - 2)   # row-major chunks of N-2
    nslot = 3
    u = np.zeros((nslot, n, n), np.float32)
    v = np.zeros((nslot, n, n), np.float32)
    for r in range(n):
        src_rows = []
        for idx in flat[r]:
            a, b = divmod(int(idx), n)
            if a not in src_rows:
                src_rows.append(a)
            m = src_rows.index(a)
            assert m < nslot, "an output row never spans more than 3 source rows"
            u[m, r, a] = 1.0
            v[m, r, b] = 1.0
    return np.concatenate([u, v], axis=0)                        # (6, N, N)


def _cluster_loss_kernel(x_ref, uv_ref, loss_ref, gacc,
                         *, ncluster, m_pad, fold, temperature):
    k = ncluster
    n = 2 * k
    fm = fold * m_pad
    one_col = n                          # index of the constant-ones column

    @pl.when(pl.program_id(0) == 0)
    def _init():
        gacc[...] = jnp.zeros_like(gacc)

    # ---- streaming phase: one fused, lane-dense Gram accumulation per tile (MXU) ----
    xt = x_ref[...]                                              # (TBF, fold*m_pad) f32
    dn = (((0,), (0,)), ((), ()))                                # contract the batch axis
    gacc[...] += lax.dot_general(xt, xt, dn, preferred_element_type=jnp.float32)

    # ---- finalize on the last grid step ----
    @pl.when(pl.program_id(0) == pl.num_programs(0) - 1)
    def _finalize():
        gf = gacc[...]                                           # (fm, fm)

        # 1) un-fold: true (m_pad, m_pad) Gram = sum of the `fold` diagonal blocks.
        #    Done with an iota-built block-diag mask + two small matmuls (sel^T (gf.mask) sel)
        #    so no unaligned slices / reshapes are needed in-kernel.
        if fold > 1:
            ib = lax.broadcasted_iota(jnp.int32, (fm, fold), 0)
            ab = lax.broadcasted_iota(jnp.int32, (fm, fold), 1)
            t = jnp.logical_and(ib >= ab * m_pad,
                                ib < ab * m_pad + m_pad).astype(jnp.float32)   # (fm, fold)
            blockdiag = lax.dot_general(t, t, (((1,), (1,)), ((), ())),
                                        preferred_element_type=jnp.float32)    # (fm, fm)
            ii = lax.broadcasted_iota(jnp.int32, (fm, m_pad), 0)
            mm = lax.broadcasted_iota(jnp.int32, (fm, m_pad), 1)
            sel = jnp.zeros((fm, m_pad), jnp.float32)
            for a in range(fold):                                # sel[i, m] = (i % m_pad == m)
                sel = sel + (ii == mm + a * m_pad).astype(jnp.float32)
            gm = gf * blockdiag
            p1 = lax.dot_general(sel, gm, (((0,), (0,)), ((), ())),
                                 preferred_element_type=jnp.float32)           # (m_pad, fm)
            g = lax.dot_general(p1, sel, (((1,), (0,)), ((), ())),
                                preferred_element_type=jnp.float32)            # (m_pad, m_pad)
        else:
            g = gf

        # 2) entropy regularizer from the ones-column row of the Gram (column sums for free)
        rr = lax.broadcasted_iota(jnp.int32, (m_pad, m_pad), 0)
        cs = jnp.sum(g * (rr == one_col).astype(jnp.float32),
                     axis=0, keepdims=True)                      # (1, m_pad) column sums
        lane = lax.broadcasted_iota(jnp.int32, (1, m_pad), 1)
        mi = (lane < k).astype(jnp.float32)
        mj = jnp.logical_and(lane >= k, lane < n).astype(jnp.float32)
        pi = cs * mi / jnp.sum(cs * mi, axis=1, keepdims=True)
        pj = cs * mj / jnp.sum(cs * mj, axis=1, keepdims=True)
        plogp = (pi * jnp.log(jnp.where(mi > 0, pi, 1.0))
                 + pj * jnp.log(jnp.where(mj > 0, pj, 1.0)))
        ne = jnp.sum(plogp, axis=1, keepdims=True) + 2.0 * math.log(k)          # (1, 1)

        # 3) cosine-normalized similarity (norms = Gram diagonal) + temperature scaling
        gram = g[0:n, 0:n]                                       # (N, N) raw Gram c c^T
        row = lax.broadcasted_iota(jnp.int32, (n, n), 0)
        col = lax.broadcasted_iota(jnp.int32, (n, n), 1)
        eye = (row == col).astype(jnp.float32)
        ssq = jnp.sum(gram * eye, axis=0, keepdims=True)         # (1, N) exact sum-of-squares
        inv_c = lax.rsqrt(ssq)                                   # (1, N)
        inv_r = jnp.sum(eye * inv_c, axis=1, keepdims=True)      # (N, 1) reorientation
        sim = gram * inv_r * inv_c * (1.0 / temperature)         # (N, N)

        # 4) positives (built from iota, gather-free) and CE with global max shift
        posmask = jnp.logical_or(col == row + k, col + k == row).astype(jnp.float32)
        pos = jnp.sum(sim * posmask, axis=1, keepdims=True)      # (N, 1)
        mx = jnp.max(jnp.max(sim, axis=1, keepdims=True), axis=0, keepdims=True)  # (1, 1)
        e = jnp.exp(sim - mx)                                    # (N, N)

        # negatives: 3 slot-structured selector matmuls instead of an O(N^3) weight tensor
        neg = None
        for m in range(3):
            term = jnp.sum(jnp.dot(uv_ref[m], e, preferred_element_type=jnp.float32)
                           * uv_ref[3 + m], axis=1, keepdims=True)              # (N, 1)
            neg = term if neg is None else neg + term

        s = jnp.exp(pos - mx) + neg                              # (N, 1) row sums of exp
        ce = mx + (jnp.sum(jnp.log(s), axis=0, keepdims=True)
                   - jnp.sum(pos, axis=0, keepdims=True)) / n    # (1, 1)

        loss_ref[0, 0] = (ce + ne)[0, 0]


@functools.partial(jax.jit, static_argnames=("ncluster", "temperature"))
def cluster_loss(ci, cj, *, ncluster, temperature):
    b, kdim = ci.shape
    assert kdim == ncluster and cj.shape == ci.shape
    assert ncluster >= 2, "ClusterLoss requires ncluster >= 2 (as in the reference)"
    n = 2 * ncluster

    ci = ci.astype(jnp.float32)
    cj = cj.astype(jnp.float32)

    # ---- feature layout: [ci | cj | ones | zero pad] --------------------------------
    m_aug = n + 1                                  # fused width + ones column
    if m_aug <= _LANE_TARGET:
        m_pad = max(8, _next_pow2(m_aug))
        fold = _LANE_TARGET // m_pad               # batch rows folded into the lane dim
    else:
        # very large ncluster: already lane-dense, no fold needed
        m_pad = _round_up(m_aug, 128)
        fold = 1
    fm = fold * m_pad

    cols = [ci, cj, jnp.ones((b, 1), jnp.float32)]
    if m_pad > m_aug:
        cols.append(jnp.zeros((b, m_pad - m_aug), jnp.float32))
    x = jnp.concatenate(cols, axis=1)              # (B, m_pad)

    # ---- batch fold + tiling (zero rows are neutral for every accumulated quantity) --
    rows_folded = -(-b // fold)
    tbf_cap = max(8, ((_TILE_BYTES // (fm * 4)) // 8) * 8)
    tbf = min(_round_up(rows_folded, 8), tbf_cap)  # folded rows per grid step (sweepable)
    bpf = _round_up(rows_folded, tbf)
    bp = bpf * fold
    if bp != b:
        x = jnp.pad(x, ((0, bp - b), (0, 0)))
    xf = x.reshape(bpf, fm)                        # lane-dense folded stream

    uv = jnp.asarray(_build_neg_selectors(ncluster))   # (6, N, N) static, O(N^2)

    loss = pl.pallas_call(
        functools.partial(_cluster_loss_kernel, ncluster=ncluster, m_pad=m_pad,
                          fold=fold, temperature=float(temperature)),
        out_shape=jax.ShapeDtypeStruct((1, 1), jnp.float32),
        grid=(bpf // tbf,),
        in_specs=[
            pl.BlockSpec((tbf, fm), lambda i: (i, 0)),        # folded batch tile
            pl.BlockSpec((6, n, n), lambda i: (0, 0, 0)),     # selectors: constant tiny block
        ],
        out_specs=pl.BlockSpec(memory_space=pltpu.MemorySpace.SMEM),  # scalar loss
        scratch_shapes=[
            pltpu.VMEM((fm, fm), jnp.float32),                # folded Gram accumulator
        ],
        compiler_params=pltpu.CompilerParams(
            dimension_semantics=("arbitrary",),
            vmem_limit_bytes=32 * 1024 * 1024),
    )(xf, uv)
    return loss[0, 0]


def _reference(ci, cj, ncluster, temperature):
    """Pure-numpy transcription of ClusterLoss.forward (float64)."""
    ci = np.asarray(ci, np.float64)
    cj = np.asarray(cj, np.float64)
    k = ncluster
    n = 2 * k
    pi = ci.sum(0)
    pi = pi / pi.sum()
    ne_i = math.log(pi.size) + (pi * np.log(pi)).sum()
    pj = cj.sum(0)
    pj = pj / pj.sum()
    ne_j = math.log(pj.size) + (pj * np.log(pj)).sum()
    c = np.concatenate([ci.T, cj.T], axis=0)                    # (N, B)
    nrm = np.linalg.norm(c, axis=1, keepdims=True)
    sim = (c @ c.T) / (nrm * nrm.T) / temperature
    mask = np.ones((n, n), dtype=bool)
    np.fill_diagonal(mask, False)
    for i in range(k):
        mask[i, k + 1] = False
        mask[k + 1, i] = False
    pos = np.concatenate([np.diagonal(sim, k), np.diagonal(sim, -k)]).reshape(n, 1)
    neg = sim[mask].reshape(n, -1)
    logits = np.concatenate([pos, neg], axis=1)
    mx = logits.max(axis=1, keepdims=True)
    lse = mx[:, 0] + np.log(np.exp(logits - mx).sum(axis=1))
    loss = (lse - logits[:, 0]).sum() / n
    return loss + ne_i + ne_j


if __name__ == "__main__":
    key = jax.random.PRNGKey(0)
    k1, k2 = jax.random.split(key)
    batch, ncluster = 16, 4
    temperature = 0.5

    # cluster assignment probabilities (softmax outputs), strictly positive
    ci = jax.nn.softmax(jax.random.normal(k1, (batch, ncluster), jnp.float32), axis=1)
    cj = jax.nn.softmax(jax.random.normal(k2, (batch, ncluster), jnp.float32), axis=1)

    loss = cluster_loss(ci, cj, ncluster=ncluster, temperature=temperature)
    loss = jax.block_until_ready(loss)

    ref = _reference(np.asarray(ci), np.asarray(cj), ncluster, temperature)
    np.testing.assert_allclose(float(loss), float(ref), rtol=2e-3, atol=2e-3)
    print("KERNEL_OK")
</pallas_src>

<mosaic_0001>
module attributes {stable_mosaic.version = 11 : i64} {
  func.func @_cluster_loss_kernel(%arg0: i32, %arg1: memref<8x256xf32, #tpu.memory_space<vmem>>, %arg2: memref<6x8x8xf32, #tpu.memory_space<vmem>>, %arg3: memref<1x1xf32, #tpu.memory_space<smem>>, %arg4: memref<256x256xf32, #tpu.memory_space<vmem>>) attributes {dimension_semantics = [#tpu.dimension_semantics<arbitrary>], iteration_bounds = array<i64: 1>, scalar_prefetch = 0 : i64, scratch_operands = 1 : i64, tpu.core_type = #tpu.core_type<tc>, window_params = [{transform_indices = @transform_0, window_bounds = array<i64: 8, 256>}, {pipeline_mode = #tpu.pipeline_mode<synchronous>, transform_indices = @transform_1, window_bounds = array<i64: 6, 8, 8>}, {transform_indices = @transform_2, window_bounds = array<i64: 1, 1>}]} {
    %c0_i32 = arith.constant 0 : i32
    %0 = arith.cmpi eq, %arg0, %c0_i32 : i32
    %1 = arith.extui %0 : i1 to i32
    %c0_i32_0 = arith.constant 0 : i32
    %2 = arith.cmpi ne, %1, %c0_i32_0 : i32
    scf.if %2 {
      %cst_8 = arith.constant 0.000000e+00 : f32
      %11 = vector.broadcast %cst_8 : f32 to vector<256x256xf32>
      %c0_9 = arith.constant 0 : index
      %c0_10 = arith.constant 0 : index
      %12 = vector.load %arg4[%c0_9, %c0_10] : memref<256x256xf32, #tpu.memory_space<vmem>>, vector<256x256xf32>
      tpu.vector_store %arg4[%c0_9, %c0_10], %11 {strides = array<i32>} : memref<256x256xf32, #tpu.memory_space<vmem>>, vector<256x256xf32>,
    } else {
    }
    %c0 = arith.constant 0 : index
    %c0_1 = arith.constant 0 : index
    %3 = vector.load %arg1[%c0, %c0_1] : memref<8x256xf32, #tpu.memory_space<vmem>>, vector<8x256xf32>
    %c0_2 = arith.constant 0 : index
    %c0_3 = arith.constant 0 : index
    %4 = vector.load %arg4[%c0_2, %c0_3] : memref<256x256xf32, #tpu.memory_space<vmem>>, vector<256x256xf32>
    %cst = arith.constant dense<0.000000e+00> : vector<256x256xf32>
    %5 = tpu.matmul %3, %3, %cst {dimension_numbers = #tpu.dot_dimension_numbers<[0], [0], [1], [1], [0, 1, 1, 1], [], []>} : vector<8x256xf32>, vector<8x256xf32>, vector<256x256xf32> -> vector<256x256xf32>
    %6 = arith.addf %4, %5 : vector<256x256xf32>
    %c0_4 = arith.constant 0 : index
    %c0_5 = arith.constant 0 : index
    %7 = vector.load %arg4[%c0_4, %c0_5] : memref<256x256xf32, #tpu.memory_space<vmem>>, vector<256x256xf32>
    tpu.vector_store %arg4[%c0_4, %c0_5], %6 {strides = array<i32>} : memref<256x256xf32, #tpu.memory_space<vmem>>, vector<256x256xf32>,
    %c0_i32_6 = arith.constant 0 : i32
    %8 = arith.cmpi eq, %arg0, %c0_i32_6 : i32
    %9 = arith.extui %8 : i1 to i32
    %c0_i32_7 = arith.constant 0 : i32
    %10 = arith.cmpi ne, %9, %c0_i32_7 : i32
    scf.if %10 {
      %c0_8 = arith.constant 0 : index
      %c0_9 = arith.constant 0 : index
      %11 = vector.load %arg4[%c0_8, %c0_9] : memref<256x256xf32, #tpu.memory_space<vmem>>, vector<256x256xf32>
      %12 = tpu.iota {dimensions = array<i32: 0>} : vector<256x16xi32>
      %13 = tpu.iota {dimensions = array<i32: 1>} : vector<256x16xi32>
      %c16_i32 = arith.constant 16 : i32
      %14 = vector.broadcast %c16_i32 : i32 to vector<256x16xi32>
      %15 = arith.muli %13, %14 : vector<256x16xi32>
      %16 = arith.cmpi sge, %12, %15 : vector<256x16xi32>
      %c16_i32_10 = arith.constant 16 : i32
      %17 = vector.broadcast %c16_i32_10 : i32 to vector<256x16xi32>
      %18 = arith.muli %13, %17 : vector<256x16xi32>
      %c16_i32_11 = arith.constant 16 : i32
      %19 = vector.broadcast %c16_i32_11 : i32 to vector<256x16xi32>
      %20 = arith.addi %18, %19 : vector<256x16xi32>
      %21 = arith.cmpi slt, %12, %20 : vector<256x16xi32>
      %22 = arith.andi %16, %21 : vector<256x16xi1>
      %23 = arith.extui %22 : vector<256x16xi1> to vector<256x16xi32>
      %24 = arith.sitofp %23 : vector<256x16xi32> to vector<256x16xf32>
      %cst_12 = arith.constant dense<0.000000e+00> : vector<256x256xf32>
      %25 = tpu.matmul %24, %24, %cst_12 {dimension_numbers = #tpu.dot_dimension_numbers<[1], [1], [0], [0], [0, 0, 1, 0], [], []>} : vector<256x16xf32>, vector<256x16xf32>, vector<256x256xf32> -> vector<256x256xf32>
      %26 = tpu.iota {dimensions = array<i32: 0>} : vector<256x16xi32>
      %27 = tpu.iota {dimensions = array<i32: 1>} : vector<256x16xi32>
      %cst_13 = arith.constant 0.000000e+00 : f32
      %28 = vector.broadcast %cst_13 : f32 to vector<256x16xf32>
      %c0_i32_14 = arith.constant 0 : i32
      %29 = vector.broadcast %c0_i32_14 : i32 to vector<256x16xi32>
      %30 = arith.addi %27, %29 : vector<256x16xi32>
      %31 = arith.cmpi eq, %26, %30 : vector<256x16xi32>
      %32 = arith.extui %31 : vector<256x16xi1> to vector<256x16xi32>
      %33 = arith.sitofp %32 : vector<256x16xi32> to vector<256x16xf32>
      %34 = arith.addf %28, %33 : vector<256x16xf32>
      %c16_i32_15 = arith.constant 16 : i32
      %35 = vector.broadcast %c16_i32_15 : i32 to vector<256x16xi32>
      %36 = arith.addi %27, %35 : vector<256x16xi32>
      %37 = arith.cmpi eq, %26, %36 : vector<256x16xi32>
      %38 = arith.extui %37 : vector<256x16xi1> to vector<256x16xi32>
      %39 = arith.sitofp %38 : vector<256x16xi32> to vector<256x16xf32>
      %40 = arith.addf %34, %39 : vector<256x16xf32>
      %c32_i32 = arith.constant 32 : i32
      %41 = vector.broadcast %c32_i32 : i32 to vector<256x16xi32>
      %42 = arith.addi %27, %41 : vector<256x16xi32>
      %43 = arith.cmpi eq, %26, %42 : vector<256x16xi32>
      %44 = arith.extui %43 : vector<256x16xi1> to vector<256x16xi32>
      %45 = arith.sitofp %44 : vector<256x16xi32> to vector<256x16xf32>
      %46 = arith.addf %40, %45 : vector<256x16xf32>
      %c48_i32 = arith.constant 48 : i32
      %47 = vector.broadcast %c48_i32 : i32 to vector<256x16xi32>
      %48 = arith.addi %27, %47 : vector<256x16xi32>
      %49 = arith.cmpi eq, %26, %48 : vector<256x16xi32>
      %50 = arith.extui %49 : vector<256x16xi1> to vector<256x16xi32>
      %51 = arith.sitofp %50 : vector<256x16xi32> to vector<256x16xf32>
      %52 = arith.addf %46, %51 : vector<256x16xf32>
      %c64_i32 = arith.constant 64 : i32
      %53 = vector.broadcast %c64_i32 : i32 to vector<256x16xi32>
      %54 = arith.addi %27, %53 : vector<256x16xi32>
      %55 = arith.cmpi eq, %26, %54 : vector<256x16xi32>
      %56 = arith.extui %55 : vector<256x16xi1> to vector<256x16xi32>
      %57 = arith.sitofp %56 : vector<256x16xi32> to vector<256x16xf32>
      %58 = arith.addf %52, %57 : vector<256x16xf32>
      %c80_i32 = arith.constant 80 : i32
      %59 = vector.broadcast %c80_i32 : i32 to vector<256x16xi32>
      %60 = arith.addi %27, %59 : vector<256x16xi32>
      %61 = arith.cmpi eq, %26, %60 : vector<256x16xi32>
      %62 = arith.extui %61 : vector<256x16xi1> to vector<256x16xi32>
      %63 = arith.sitofp %62 : vector<256x16xi32> to vector<256x16xf32>
      %64 = arith.addf %58, %63 : vector<256x16xf32>
      %c96_i32 = arith.constant 96 : i32
      %65 = vector.broadcast %c96_i32 : i32 to vector<256x16xi32>
      %66 = arith.addi %27, %65 : vector<256x16xi32>
      %67 = arith.cmpi eq, %26, %66 : vector<256x16xi32>
      %68 = arith.extui %67 : vector<256x16xi1> to vector<256x16xi32>
      %69 = arith.sitofp %68 : vector<256x16xi32> to vector<256x16xf32>
      %70 = arith.addf %64, %69 : vector<256x16xf32>
      %c112_i32 = arith.constant 112 : i32
      %71 = vector.broadcast %c112_i32 : i32 to vector<256x16xi32>
      %72 = arith.addi %27, %71 : vector<256x16xi32>
      %73 = arith.cmpi eq, %26, %72 : vector<256x16xi32>
      %74 = arith.extui %73 : vector<256x16xi1> to vector<256x16xi32>
      %75 = arith.sitofp %74 : vector<256x16xi32> to vector<256x16xf32>
      %76 = arith.addf %70, %75 : vector<256x16xf32>
      %c128_i32 = arith.constant 128 : i32
      %77 = vector.broadcast %c128_i32 : i32 to vector<256x16xi32>
      %78 = arith.addi %27, %77 : vector<256x16xi32>
      %79 = arith.cmpi eq, %26, %78 : vector<256x16xi32>
      %80 = arith.extui %79 : vector<256x16xi1> to vector<256x16xi32>
      %81 = arith.sitofp %80 : vector<256x16xi32> to vector<256x16xf32>
      %82 = arith.addf %76, %81 : vector<256x16xf32>
      %c144_i32 = arith.constant 144 : i32
      %83 = vector.broadcast %c144_i32 : i32 to vector<256x16xi32>
      %84 = arith.addi %27, %83 : vector<256x16xi32>
      %85 = arith.cmpi eq, %26, %84 : vector<256x16xi32>
      %86 = arith.extui %85 : vector<256x16xi1> to vector<256x16xi32>
      %87 = arith.sitofp %86 : vector<256x16xi32> to vector<256x16xf32>
      %88 = arith.addf %82, %87 : vector<256x16xf32>
      %c160_i32 = arith.constant 160 : i32
      %89 = vector.broadcast %c160_i32 : i32 to vector<256x16xi32>
      %90 = arith.addi %27, %89 : vector<256x16xi32>
      %91 = arith.cmpi eq, %26, %90 : vector<256x16xi32>
      %92 = arith.extui %91 : vector<256x16xi1> to vector<256x16xi32>
      %93 = arith.sitofp %92 : vector<256x16xi32> to vector<256x16xf32>
      %94 = arith.addf %88, %93 : vector<256x16xf32>
      %c176_i32 = arith.constant 176 : i32
      %95 = vector.broadcast %c176_i32 : i32 to vector<256x16xi32>
      %96 = arith.addi %27, %95 : vector<256x16xi32>
      %97 = arith.cmpi eq, %26, %96 : vector<256x16xi32>
      %98 = arith.extui %97 : vector<256x16xi1> to vector<256x16xi32>
      %99 = arith.sitofp %98 : vector<256x16xi32> to vector<256x16xf32>
      %100 = arith.addf %94, %99 : vector<256x16xf32>
      %c192_i32 = arith.constant 192 : i32
      %101 = vector.broadcast %c192_i32 : i32 to vector<256x16xi32>
      %102 = arith.addi %27, %101 : vector<256x16xi32>
      %103 = arith.cmpi eq, %26, %102 : vector<256x16xi32>
      %104 = arith.extui %103 : vector<256x16xi1> to vector<256x16xi32>
      %105 = arith.sitofp %104 : vector<256x16xi32> to vector<256x16xf32>
      %106 = arith.addf %100, %105 : vector<256x16xf32>
      %c208_i32 = arith.constant 208 : i32
      %107 = vector.broadcast %c208_i32 : i32 to vector<256x16xi32>
      %108 = arith.addi %27, %107 : vector<256x16xi32>
      %109 = arith.cmpi eq, %26, %108 : vector<256x16xi32>
      %110 = arith.extui %109 : vector<256x16xi1> to vector<256x16xi32>
      %111 = arith.sitofp %110 : vector<256x16xi32> to vector<256x16xf32>
      %112 = arith.addf %106, %111 : vector<256x16xf32>
      %c224_i32 = arith.constant 224 : i32
      %113 = vector.broadcast %c224_i32 : i32 to vector<256x16xi32>
      %114 = arith.addi %27, %113 : vector<256x16xi32>
      %115 = arith.cmpi eq, %26, %114 : vector<256x16xi32>
      %116 = arith.extui %115 : vector<256x16xi1> to vector<256x16xi32>
      %117 = arith.sitofp %116 : vector<256x16xi32> to vector<256x16xf32>
      %118 = arith.addf %112, %117 : vector<256x16xf32>
      %c240_i32 = arith.constant 240 : i32
      %119 = vector.broadcast %c240_i32 : i32 to vector<256x16xi32>
      %120 = arith.addi %27, %119 : vector<256x16xi32>
      %121 = arith.cmpi eq, %26, %120 : vector<256x16xi32>
      %122 = arith.extui %121 : vector<256x16xi1> to vector<256x16xi32>
      %123 = arith.sitofp %122 : vector<256x16xi32> to vector<256x16xf32>
      %124 = arith.addf %118, %123 : vector<256x16xf32>
      %125 = arith.mulf %11, %25 : vector<256x256xf32>
      %cst_16 = arith.constant dense<0.000000e+00> : vector<16x256xf32>
      %126 = tpu.matmul %124, %125, %cst_16 {dimension_numbers = #tpu.dot_dimension_numbers<[0], [0], [1], [1], [0, 1, 1, 1], [], []>} : vector<256x16xf32>, vector<256x256xf32>, vector<16x256xf32> -> vector<16x256xf32>
      %cst_17 = arith.constant dense<0.000000e+00> : vector<16x16xf32>
      %127 = tpu.matmul %126, %124, %cst_17 {dimension_numbers = #tpu.dot_dimension_numbers<[1], [0], [0], [1], [0, 0, 1, 1], [], []>} : vector<16x256xf32>, vector<256x16xf32>, vector<16x16xf32> -> vector<16x16xf32>
      %128 = tpu.iota {dimensions = array<i32: 0>} : vector<16x16xi32>
      %c8_i32 = arith.constant 8 : i32
      %129 = vector.broadcast %c8_i32 : i32 to vector<16x16xi32>
      %130 = arith.cmpi eq, %128, %129 : vector<16x16xi32>
      %131 = arith.extui %130 : vector<16x16xi1> to vector<16x16xi32>
      %132 = arith.sitofp %131 : vector<16x16xi32> to vector<16x16xf32>
      %133 = arith.mulf %127, %132 : vector<16x16xf32>
      %cst_18 = arith.constant dense<0.000000e+00> : vector<16xf32>
      %134 = vector.multi_reduction <add>, %133, %cst_18 [0] : vector<16x16xf32> to vector<16xf32>
      %135 = vector.shape_cast %134 : vector<16xf32> to vector<1x16xf32>
      %136 = tpu.iota {dimensions = array<i32: 1>} : vector<1x16xi32>
      %c4_i32 = arith.constant 4 : i32
      %137 = vector.broadcast %c4_i32 : i32 to vector<1x16xi32>
      %138 = arith.cmpi slt, %136, %137 : vector<1x16xi32>
      %139 = arith.extui %138 : vector<1x16xi1> to vector<1x16xi32>
      %140 = arith.sitofp %139 : vector<1x16xi32> to vector<1x16xf32>
      %c4_i32_19 = arith.constant 4 : i32
      %141 = vector.broadcast %c4_i32_19 : i32 to vector<1x16xi32>
      %142 = arith.cmpi sge, %136, %141 : vector<1x16xi32>
      %c8_i32_20 = arith.constant 8 : i32
      %143 = vector.broadcast %c8_i32_20 : i32 to vector<1x16xi32>
      %144 = arith.cmpi slt, %136, %143 : vector<1x16xi32>
      %145 = arith.andi %142, %144 : vector<1x16xi1>
      %146 = arith.extui %145 : vector<1x16xi1> to vector<1x16xi32>
      %147 = arith.sitofp %146 : vector<1x16xi32> to vector<1x16xf32>
      %148 = arith.mulf %135, %140 : vector<1x16xf32>
      %149 = arith.mulf %135, %140 : vector<1x16xf32>
      %cst_21 = arith.constant dense<0.000000e+00> : vector<1xf32>
      %150 = vector.multi_reduction <add>, %149, %cst_21 [1] : vector<1x16xf32> to vector<1xf32>
      %151 = vector.shape_cast %150 : vector<1xf32> to vector<1x1xf32>
      %152 = vector.broadcast %151 : vector<1x1xf32> to vector<1x16xf32>
      %153 = arith.divf %148, %152 : vector<1x16xf32>
      %154 = arith.mulf %135, %147 : vector<1x16xf32>
      %155 = arith.mulf %135, %147 : vector<1x16xf32>
      %cst_22 = arith.constant dense<0.000000e+00> : vector<1xf32>
      %156 = vector.multi_reduction <add>, %155, %cst_22 [1] : vector<1x16xf32> to vector<1xf32>
      %157 = vector.shape_cast %156 : vector<1xf32> to vector<1x1xf32>
      %158 = vector.broadcast %157 : vector<1x1xf32> to vector<1x16xf32>
      %159 = arith.divf %154, %158 : vector<1x16xf32>
      %cst_23 = arith.constant 0.000000e+00 : f32
      %160 = vector.broadcast %cst_23 : f32 to vector<1x16xf32>
      %161 = arith.cmpf ogt, %140, %160 : vector<1x16xf32>
      %cst_24 = arith.constant 1.000000e+00 : f32
      %162 = vector.broadcast %cst_24 : f32 to vector<1x16xf32>
      %163 = arith.select %161, %153, %162 : vector<1x16xi1>, vector<1x16xf32>
      %164 = math.log %163 : vector<1x16xf32>
      %165 = arith.mulf %153, %164 : vector<1x16xf32>
      %cst_25 = arith.constant 0.000000e+00 : f32
      %166 = vector.broadcast %cst_25 : f32 to vector<1x16xf32>
      %167 = arith.cmpf ogt, %147, %166 : vector<1x16xf32>
      %cst_26 = arith.constant 1.000000e+00 : f32
      %168 = vector.broadcast %cst_26 : f32 to vector<1x16xf32>
      %169 = arith.select %167, %159, %168 : vector<1x16xi1>, vector<1x16xf32>
      %170 = math.log %169 : vector<1x16xf32>
      %171 = arith.mulf %159, %170 : vector<1x16xf32>
      %172 = arith.addf %165, %171 : vector<1x16xf32>
      %cst_27 = arith.constant dense<0.000000e+00> : vector<1xf32>
      %173 = vector.multi_reduction <add>, %172, %cst_27 [1] : vector<1x16xf32> to vector<1xf32>
      %174 = vector.shape_cast %173 : vector<1xf32> to vector<1x1xf32>
      %cst_28 = arith.constant 2.77258873 : f32
      %175 = vector.broadcast %cst_28 : f32 to vector<1x1xf32>
      %176 = arith.addf %174, %175 : vector<1x1xf32>
      %177 = vector.extract_strided_slice %127 {offsets = [0, 0], sizes = [8, 8], strides = [1, 1]} : vector<16x16xf32> to vector<8x8xf32>
      %178 = tpu.iota {dimensions = array<i32: 0>} : vector<8x8xi32>
      %179 = tpu.iota {dimensions = array<i32: 1>} : vector<8x8xi32>
      %180 = arith.cmpi eq, %178, %179 : vector<8x8xi32>
      %181 = arith.extui %180 : vector<8x8xi1> to vector<8x8xi32>
      %182 = arith.sitofp %181 : vector<8x8xi32> to vector<8x8xf32>
      %183 = arith.mulf %177, %182 : vector<8x8xf32>
      %cst_29 = arith.constant dense<0.000000e+00> : vector<8xf32>
      %184 = vector.multi_reduction <add>, %183, %cst_29 [0] : vector<8x8xf32> to vector<8xf32>
      %185 = vector.shape_cast %184 : vector<8xf32> to vector<1x8xf32>
      %186 = math.rsqrt %185 : vector<1x8xf32>
      %187 = vector.broadcast %186 : vector<1x8xf32> to vector<8x8xf32>
      %188 = arith.mulf %182, %187 : vector<8x8xf32>
      %cst_30 = arith.constant dense<0.000000e+00> : vector<8xf32>
      %189 = vector.multi_reduction <add>, %188, %cst_30 [1] : vector<8x8xf32> to vector<8xf32>
      %190 = vector.shape_cast %189 : vector<8xf32> to vector<8x1xf32>
      %191 = vector.broadcast %190 : vector<8x1xf32> to vector<8x8xf32>
      %192 = arith.mulf %177, %191 : vector<8x8xf32>
      %193 = vector.broadcast %186 : vector<1x8xf32> to vector<8x8xf32>
      %194 = arith.mulf %192, %193 : vector<8x8xf32>
      %cst_31 = arith.constant 2.000000e+00 : f32
      %195 = vector.broadcast %cst_31 : f32 to vector<8x8xf32>
      %196 = arith.mulf %194, %195 : vector<8x8xf32>
      %c4_i32_32 = arith.constant 4 : i32
      %197 = vector.broadcast %c4_i32_32 : i32 to vector<8x8xi32>
      %198 = arith.addi %178, %197 : vector<8x8xi32>
      %199 = arith.cmpi eq, %179, %198 : vector<8x8xi32>
      %c4_i32_33 = arith.constant 4 : i32
      %200 = vector.broadcast %c4_i32_33 : i32 to vector<8x8xi32>
      %201 = arith.addi %179, %200 : vector<8x8xi32>
      %202 = arith.cmpi eq, %201, %178 : vector<8x8xi32>
      %203 = arith.ori %199, %202 : vector<8x8xi1>
      %204 = arith.extui %203 : vector<8x8xi1> to vector<8x8xi32>
      %205 = arith.sitofp %204 : vector<8x8xi32> to vector<8x8xf32>
      %206 = arith.mulf %196, %205 : vector<8x8xf32>
      %cst_34 = arith.constant dense<0.000000e+00> : vector<8xf32>
      %207 = vector.multi_reduction <add>, %206, %cst_34 [1] : vector<8x8xf32> to vector<8xf32>
      %208 = vector.shape_cast %207 : vector<8xf32> to vector<8x1xf32>
      %cst_35 = arith.constant dense<0xFF800000> : vector<8xf32>
      %209 = vector.multi_reduction <maximumf>, %196, %cst_35 [1] : vector<8x8xf32> to vector<8xf32>
      %210 = vector.shape_cast %209 : vector<8xf32> to vector<8x1xf32>
      %cst_36 = arith.constant dense<0xFF800000> : vector<1xf32>
      %211 = vector.multi_reduction <maximumf>, %210, %cst_36 [0] : vector<8x1xf32> to vector<1xf32>
      %212 = vector.shape_cast %211 : vector<1xf32> to vector<1x1xf32>
      %213 = vector.broadcast %212 : vector<1x1xf32> to vector<8x8xf32>
      %214 = arith.subf %196, %213 : vector<8x8xf32>
      %215 = math.exp %214 : vector<8x8xf32>
      %c0_37 = arith.constant 0 : index
      %c0_38 = arith.constant 0 : index
      %c0_39 = arith.constant 0 : index
      %216 = vector.load %arg2[%c0_37, %c0_38, %c0_39] : memref<6x8x8xf32, #tpu.memory_space<vmem>>, vector<1x8x8xf32>
      %217 = vector.shape_cast %216 : vector<1x8x8xf32> to vector<8x8xf32>
      %cst_40 = arith.constant dense<0.000000e+00> : vector<8x8xf32>
      %218 = tpu.matmul %217, %215, %cst_40 {dimension_numbers = #tpu.dot_dimension_numbers<[1], [0], [0], [1], [0, 0, 1, 1], [], []>} : vector<8x8xf32>, vector<8x8xf32>, vector<8x8xf32> -> vector<8x8xf32>
      %c3 = arith.constant 3 : index
      %c0_41 = arith.constant 0 : index
      %c0_42 = arith.constant 0 : index
      %219 = vector.load %arg2[%c3, %c0_41, %c0_42] : memref<6x8x8xf32, #tpu.memory_space<vmem>>, vector<1x8x8xf32>
      %220 = vector.shape_cast %219 : vector<1x8x8xf32> to vector<8x8xf32>
      %221 = arith.mulf %218, %220 : vector<8x8xf32>
      %cst_43 = arith.constant dense<0.000000e+00> : vector<8xf32>
      %222 = vector.multi_reduction <add>, %221, %cst_43 [1] : vector<8x8xf32> to vector<8xf32>
      %223 = vector.shape_cast %222 : vector<8xf32> to vector<8x1xf32>
      %c1 = arith.constant 1 : index
      %c0_44 = arith.constant 0 : index
      %c0_45 = arith.constant 0 : index
      %224 = vector.load %arg2[%c1, %c0_44, %c0_45] : memref<6x8x8xf32, #tpu.memory_space<vmem>>, vector<1x8x8xf32>
      %225 = vector.shape_cast %224 : vector<1x8x8xf32> to vector<8x8xf32>
      %cst_46 = arith.constant dense<0.000000e+00> : vector<8x8xf32>
      %226 = tpu.matmul %225, %215, %cst_46 {dimension_numbers = #tpu.dot_dimension_numbers<[1], [0], [0], [1], [0, 0, 1, 1], [], []>} : vector<8x8xf32>, vector<8x8xf32>, vector<8x8xf32> -> vector<8x8xf32>
      %c4 = arith.constant 4 : index
      %c0_47 = arith.constant 0 : index
      %c0_48 = arith.constant 0 : index
      %227 = vector.load %arg2[%c4, %c0_47, %c0_48] : memref<6x8x8xf32, #tpu.memory_space<vmem>>, vector<1x8x8xf32>
      %228 = vector.shape_cast %227 : vector<1x8x8xf32> to vector<8x8xf32>
      %229 = arith.mulf %226, %228 : vector<8x8xf32>
      %cst_49 = arith.constant dense<0.000000e+00> : vector<8xf32>
      %230 = vector.multi_reduction <add>, %229, %cst_49 [1] : vector<8x8xf32> to vector<8xf32>
      %231 = vector.shape_cast %230 : vector<8xf32> to vector<8x1xf32>
      %232 = arith.addf %223, %231 : vector<8x1xf32>
      %c2 = arith.constant 2 : index
      %c0_50 = arith.constant 0 : index
      %c0_51 = arith.constant 0 : index
      %233 = vector.load %arg2[%c2, %c0_50, %c0_51] : memref<6x8x8xf32, #tpu.memory_space<vmem>>, vector<1x8x8xf32>
      %234 = vector.shape_cast %233 : vector<1x8x8xf32> to vector<8x8xf32>
      %cst_52 = arith.constant dense<0.000000e+00> : vector<8x8xf32>
      %235 = tpu.matmul %234, %215, %cst_52 {dimension_numbers = #tpu.dot_dimension_numbers<[1], [0], [0], [1], [0, 0, 1, 1], [], []>} : vector<8x8xf32>, vector<8x8xf32>, vector<8x8xf32> -> vector<8x8xf32>
      %c5 = arith.constant 5 : index
      %c0_53 = arith.constant 0 : index
      %c0_54 = arith.constant 0 : index
      %236 = vector.load %arg2[%c5, %c0_53, %c0_54] : memref<6x8x8xf32, #tpu.memory_space<vmem>>, vector<1x8x8xf32>
      %237 = vector.shape_cast %236 : vector<1x8x8xf32> to vector<8x8xf32>
      %238 = arith.mulf %235, %237 : vector<8x8xf32>
      %cst_55 = arith.constant dense<0.000000e+00> : vector<8xf32>
      %239 = vector.multi_reduction <add>, %238, %cst_55 [1] : vector<8x8xf32> to vector<8xf32>
      %240 = vector.shape_cast %239 : vector<8xf32> to vector<8x1xf32>
      %241 = arith.addf %232, %240 : vector<8x1xf32>
      %242 = vector.broadcast %212 : vector<1x1xf32> to vector<8x1xf32>
      %243 = arith.subf %208, %242 : vector<8x1xf32>
      %244 = math.exp %243 : vector<8x1xf32>
      %245 = arith.addf %244, %241 : vector<8x1xf32>
      %246 = math.log %245 : vector<8x1xf32>
      %cst_56 = arith.constant dense<0.000000e+00> : vector<1xf32>
      %247 = vector.multi_reduction <add>, %246, %cst_56 [0] : vector<8x1xf32> to vector<1xf32>
      %248 = vector.shape_cast %247 : vector<1xf32> to vector<1x1xf32>
      %cst_57 = arith.constant dense<0.000000e+00> : vector<1xf32>
      %249 = vector.multi_reduction <add>, %208, %cst_57 [0] : vector<8x1xf32> to vector<1xf32>
      %250 = vector.shape_cast %249 : vector<1xf32> to vector<1x1xf32>
      %251 = arith.subf %248, %250 : vector<1x1xf32>
      %cst_58 = arith.constant 8.000000e+00 : f32
      %252 = vector.broadcast %cst_58 : f32 to vector<1x1xf32>
      %253 = arith.divf %251, %252 : vector<1x1xf32>
      %254 = arith.addf %212, %253 : vector<1x1xf32>
      %255 = arith.addf %254, %176 : vector<1x1xf32>
      %256 = vector.extract %255[0, 0] : f32 from vector<1x1xf32>
      %c0_59 = arith.constant 0 : index
      %c0_60 = arith.constant 0 : index
      %257 = memref.load %arg3[%c0_59, %c0_60] : memref<1x1xf32, #tpu.memory_space<smem>>
      memref.store %256, %arg3[%c0_59, %c0_60] : memref<1x1xf32, #tpu.memory_space<smem>>
    } else {
    }
    return
  }
  func.func @transform_0(%arg0: i32) -> (i32, i32) {
    %c0_i32 = arith.constant 0 : i32
    %c0_i32_0 = arith.constant 0 : i32
    return %arg0, %c0_i32 : i32, i32
  }
  func.func @transform_1(%arg0: i32) -> (i32, i32, i32) {
    %c0_i32 = arith.constant 0 : i32
    %c0_i32_0 = arith.constant 0 : i32
    %c0_i32_1 = arith.constant 0 : i32
    %c0_i32_2 = arith.constant 0 : i32
    return %c0_i32, %c0_i32_0, %c0_i32_1 : i32, i32, i32
  }
  func.func @transform_2(%arg0: i32) -> (i32, i32) {
    %c0_i32 = arith.constant 0 : i32
    %c0_i32_0 = arith.constant 0 : i32
    %c0_i32_1 = arith.constant 0 : i32
    return %c0_i32, %c0_i32_0 : i32, i32
  }
}

</mosaic_0001>

<bundles_post_ra>
// kernel: cluster_loss.1
= control target key start
LH: loop header
LB: loop body
LE: loop exit
PB: predicated region body
PF: predicated region fallthrough
CT: control target
= control target key end

     0   :  { %v759_v1 = vlaneseq  ;;  %s6458_s0 = inlined_call_operand.vmem [shape: f32[8,256], index: 0, kind: input, shape index: {}]   ;;  %s6459_s1 = inlined_call_operand.vmem [shape: f32[6,8,8], index: 1, kind: input, shape index: {}]   ;;  %s6460_s2 = inlined_call_operand.hbm [shape: f32[1,1], index: 2, kind: output, shape index: {}]  }
   0x1   :  { %v80_v0 = vld [vmem:[%s6458_s0] sm:$0xff]  ;;  %v4769_v2 = vld [vmem:[%s6458_s0 + $0x8] sm:$0xff] }
   0x2   :  { %7 = vsyncpa [#allocation4], 0  ;;  %146 = vxpose.xlu0.b32.start.end [1/1] (short) %v80_v0, 128  ;;  %307 = vmatprep.subr.mxu0 %v4769_v2  ;;  %v4772_v3 = vshrl.u32 %v759_v1, 7  ;;  %v4774_v4 = vand.u32 127, %v759_v1  ;;  %v6461_v5 = vmov 0.0   ;;  %vm956_vm0 = vcmask 130048  }
   0x3   :  { %371 = vmatprep.mubr.f32.mxu0 %v6461_v5  ;;  %308 = vmatpush1.msra.mxu0 %v80_v0  ;;  %vm4814_vm5 = vmpackc.low %vm956_vm0, %vm956_vm0  ;;  %s4732_s26 = scalar_lea.hbm %s6460_s2, 16 }
   0x4   :  { %6504 = vst [vmem:[#allocation6_spill] sm:$0xff] %v4772_v3  ;;  %v4778_v6 = vadd.s32 128, %v4772_v3  ;;  %v4781_v7 = vadd.s32 136, %v4772_v3  ;;  %v4784_v8 = vmul.u32 16, %v4774_v4  ;;  %v4787_v9 = vadd.s32 8, %v4772_v3  ;;  %p4733_p0 = scmp.ne.s32.totalorder %s6460_s2, %s4732_s26  ;;  %p4736_p1 = scmp.lt.u32.totalorder %s4732_s26, %s6460_s2 }
   0x5   :  { %v4790_v10 = vadd.s32 144, %v4772_v3  ;;  %v4798_v12 = vadd.s32 152, %v4772_v3  ;;  %v4803_v13 = vadd.s32 16, %v4772_v3  ;;  %v4806_v14 = vadd.s32 24, %v4772_v3 }
   0x6   :  { %6505 = vst [vmem:[#allocation7_spill] sm:$0xff] %v4787_v9  ;;  %vm811_vm1 = vcmp.ge.s32.totalorder %v4778_v6, %v4784_v8  ;;  %v4795_v11 = vadd.s32 16, %v4784_v8  ;;  %vm812_vm2 = vcmp.ge.s32.totalorder %v4781_v7, %v4784_v8  ;;  %vm795_vm6 = vcmp.ge.s32.totalorder %v4772_v3, %v4784_v8  ;;  %p4738_p2 = pnand %p4736_p1, %p4733_p0 }
   0x7   :  { %vm796_vm9 = vcmp.ge.s32.totalorder %v4787_v9, %v4784_v8  ;;  %vm813_vm11 = vcmp.ge.s32.totalorder %v4790_v10, %v4784_v8  ;;  %vm814_vm13 = vcmp.ge.s32.totalorder %v4798_v12, %v4784_v8  ;;  %v4836_v17 = vadd.s32 160, %v4772_v3 }
   0x8   :  { %vm844_vm3 = vcmp.lt.s32.totalorder %v4778_v6, %v4795_v11  ;;  %vm845_vm4 = vcmp.lt.s32.totalorder %v4781_v7, %v4795_v11  ;;  %vm828_vm7 = vcmp.lt.s32.totalorder %v4772_v3, %v4795_v11  ;;  %vm829_vm10 = vcmp.lt.s32.totalorder %v4787_v9, %v4795_v11 }
   0x9   :  { %vm876_vm8 = vmand %vm811_vm1, %vm844_vm3  ;;  %vm846_vm14 = vcmp.lt.s32.totalorder %v4790_v10, %v4795_v11  ;;  %vm847_vm1 = vcmp.lt.s32.totalorder %v4798_v12, %v4795_v11  ;;  %v4846_v19 = vadd.s32 168, %v4772_v3  ;;  %v4866_v23 = vadd.s32 32, %v4772_v3 }
   0xa   :  { %vm877_vm12 = vmand %vm812_vm2, %vm845_vm4  ;;  %v4829_v16 = vsel %vm876_vm8, 1.0, %v6461_v5  ;;  %vm797_vm2 = vcmp.ge.s32.totalorder %v4803_v13, %v4784_v8  ;;  %vm798_vm4 = vcmp.ge.s32.totalorder %v4806_v14, %v4784_v8  ;;  %vm831_vm8 = vcmp.lt.s32.totalorder %v4806_v14, %v4795_v11 }
   0xb   :  { %v4839_v18 = vsel %vm877_vm12, 1.0, %v6461_v5  ;;  %vm860_vm15 = vmand %vm795_vm6, %vm828_vm7  ;;  %vm830_vm6 = vcmp.lt.s32.totalorder %v4803_v13, %v4795_v11  ;;  %v4869_v24 = vadd.s32 40, %v4772_v3  ;;  %v4901_v28 = vadd.s32 176, %v4772_v3 }
   0xc   :  { %v4524_v20 = vpack.c.bf16 %v4839_v18, %v4829_v16  ;;  %vm861_vm3 = vmand %vm796_vm9, %vm829_vm10  ;;  %v4851_v21 = vsel %vm860_vm15, 1.0, %v6461_v5  ;;  %vm815_vm10 = vcmp.ge.s32.totalorder %v4836_v17, %v4784_v8  ;;  %v4914_v30 = vadd.s32 184, %v4772_v3 }
   0xd   :  { %v4858_v22 = vsel %vm861_vm3, 1.0, %v6461_v5  ;;  %vm878_vm7 = vmand %vm813_vm11, %vm846_vm14  ;;  %4401 = vmatprep.mubr.msk.f32.mxu1 %vm956_vm0, %v4851_v21  ;;  %vm848_vm11 = vcmp.lt.s32.totalorder %v4836_v17, %v4795_v11  ;;  %vm816_vm14 = vcmp.ge.s32.totalorder %v4846_v19, %v4784_v8  ;;  %vm832_vm3 = vcmp.lt.s32.totalorder %v4866_v23, %v4795_v11 }
   0xe   :  { %4526 = vmatprep.subr.msk.bf16.mxu1 %vm4814_vm5, %v4524_v20  ;;  %v4527_v25 = vpack.c.bf16 %v4858_v22, %v4851_v21  ;;  %vm879_vm9 = vmand %vm814_vm13, %vm847_vm1  ;;  %v4884_v26 = vsel %vm878_vm7, 1.0, %v6461_v5  ;;  %vm849_vm13 = vcmp.lt.s32.totalorder %v4846_v19, %v4795_v11  ;;  %vm833_vm7 = vcmp.lt.s32.totalorder %v4869_v24, %v4795_v11 }
   0xf   :  { %v4891_v27 = vsel %vm879_vm9, 1.0, %v6461_v5  ;;  %vm862_vm12 = vmand %vm797_vm2, %vm830_vm6  ;;  %vm799_vm2 = vcmp.ge.s32.totalorder %v4866_v23, %v4784_v8  ;;  %vm800_vm6 = vcmp.ge.s32.totalorder %v4869_v24, %v4784_v8  ;;  %vm850_vm9 = vcmp.lt.s32.totalorder %v4901_v28, %v4795_v11 }
  0x10   :  { %4529 = vmatpush3.bf16.xpose.msk.msra.mxu1 %vm4814_vm5, %v4527_v25  ;;  %v4530_v29 = vpack.c.bf16 %v4891_v27, %v4884_v26  ;;  %vm863_vm15 = vmand %vm798_vm4, %vm831_vm8  ;;  %v4917_v31 = vsel %vm862_vm12, 1.0, %v6461_v5  ;;  %vm817_vm8 = vcmp.ge.s32.totalorder %v4901_v28, %v4784_v8  ;;  %vm851_vm12 = vcmp.lt.s32.totalorder %v4914_v30, %v4795_v11 }
  0x11   :  { %v4920_v32 = vsel %vm863_vm15, 1.0, %v6461_v5  ;;  %vm880_vm1 = vmand %vm815_vm10, %vm848_vm11  ;;  %vm818_vm11 = vcmp.ge.s32.totalorder %v4914_v30, %v4784_v8  ;;  %v4951_v37 = vadd.s32 48, %v4772_v3  ;;  %v4954_v38 = vadd.s32 56, %v4772_v3 }
  0x12   :  { %4532 = vmatprep.subr.msk.bf16.mxu1 %vm4814_vm5, %v4530_v29  ;;  %vm881_vm4 = vmand %vm816_vm14, %vm849_vm13  ;;  %v4929_v33 = vsel %vm880_vm1, 1.0, %v6461_v5  ;;  %v4533_v35 = vpack.c.bf16 %v4920_v32, %v4917_v31  ;;  %v4957_v39 = vadd.s32 192, %v4772_v3  ;;  %v4962_v40 = vadd.s32 200, %v4772_v3 }
  0x13   :  { %v4936_v34 = vsel %vm881_vm4, 1.0, %v6461_v5  ;;  %vm864_vm10 = vmand %vm799_vm2, %vm832_vm3  ;;  %vm801_vm1 = vcmp.ge.s32.totalorder %v4951_v37, %v4784_v8  ;;  %vm834_vm2 = vcmp.lt.s32.totalorder %v4951_v37, %v4795_v11  ;;  %vm802_vm3 = vcmp.ge.s32.totalorder %v4954_v38, %v4784_v8 }
  0x14   :  { %v4536_v36 = vpack.c.bf16 %v4936_v34, %v4929_v33  ;;  %vm865_vm14 = vmand %vm800_vm6, %vm833_vm7  ;;  %v4967_v41 = vsel %vm864_vm10, 1.0, %v6461_v5  ;;  %vm835_vm4 = vcmp.lt.s32.totalorder %v4954_v38, %v4795_v11  ;;  %vm819_vm6 = vcmp.ge.s32.totalorder %v4957_v39, %v4784_v8 }
  0x15   :  { %vm882_vm13 = vmand %vm817_vm8, %vm850_vm9  ;;  %v4970_v42 = vsel %vm865_vm14, 1.0, %v6461_v5  ;;  %vm852_vm7 = vcmp.lt.s32.totalorder %v4957_v39, %v4795_v11  ;;  %vm820_vm9 = vcmp.ge.s32.totalorder %v4962_v40, %v4784_v8  ;;  %vm853_vm10 = vcmp.lt.s32.totalorder %v4962_v40, %v4795_v11 }
  0x16   :  { %vm883_vm15 = vmand %vm818_vm11, %vm851_vm12  ;;  %v4977_v43 = vsel %vm882_vm13, 1.0, %v6461_v5  ;;  %v4539_v45 = vpack.c.bf16 %v4970_v42, %v4967_v41  ;;  %v4999_v47 = vadd.s32 64, %v4772_v3  ;;  %v5002_v48 = vadd.s32 72, %v4772_v3 }
  0x17   :  { %v4980_v44 = vsel %vm883_vm15, 1.0, %v6461_v5  ;;  %vm866_vm8 = vmand %vm801_vm1, %vm834_vm2  ;;  %v5005_v49 = vadd.s32 208, %v4772_v3  ;;  %v5010_v50 = vadd.s32 216, %v4772_v3  ;;  %v5047_v57 = vadd.s32 80, %v4772_v3 }
  0x18   :  { %4535 = vmatpush3.bf16.xpose.msk.msra.mxu1 %vm4814_vm5, %v4533_v35  ;;  %v4542_v46 = vpack.c.bf16 %v4980_v44, %v4977_v43  ;;  %vm867_vm11 = vmand %vm802_vm3, %vm835_vm4  ;;  %v5015_v51 = vsel %vm866_vm8, 1.0, %v6461_v5  ;;  %vm803_vm13 = vcmp.ge.s32.totalorder %v4999_v47, %v4784_v8  ;;  %vm836_vm15 = vcmp.lt.s32.totalorder %v4999_v47, %v4795_v11 }
  0x19   :  { %4538 = vmatprep.subr.msk.bf16.mxu1 %vm4814_vm5, %v4536_v36  ;;  %vm884_vm12 = vmand %vm819_vm6, %vm852_vm7  ;;  %6508 = vst [vmem:[#allocation8_spill] sm:$0xff] %v5010_v50  ;;  %v5018_v52 = vsel %vm867_vm11, 1.0, %v6461_v5  ;;  %vm804_vm1 = vcmp.ge.s32.totalorder %v5002_v48, %v4784_v8  ;;  %vm837_vm2 = vcmp.lt.s32.totalorder %v5002_v48, %v4795_v11  ;;  %vm821_vm3 = vcmp.ge.s32.totalorder %v5005_v49, %v4784_v8 }
  0x1a   :  { %vm885_vm14 = vmand %vm820_vm9, %vm853_vm10  ;;  %v5025_v53 = vsel %vm884_vm12, 1.0, %v6461_v5  ;;  %vm854_vm4 = vcmp.lt.s32.totalorder %v5005_v49, %v4795_v11  ;;  %v4545_v55 = vpack.c.bf16 %v5018_v52, %v5015_v51  ;;  %vm822_vm7 = vcmp.ge.s32.totalorder %v5010_v50, %v4784_v8 }
  0x1b   :  { %v5028_v54 = vsel %vm885_vm14, 1.0, %v6461_v5  ;;  %vm868_vm6 = vmand %vm803_vm13, %vm836_vm15  ;;  %vm855_vm8 = vcmp.lt.s32.totalorder %v5010_v50, %v4795_v11  ;;  %v5050_v58 = vadd.s32 88, %v4772_v3  ;;  %v5053_v59 = vadd.s32 224, %v4772_v3 }
  0x1c   :  { %v4548_v56 = vpack.c.bf16 %v5028_v54, %v5025_v53  ;;  %vm869_vm9 = vmand %vm804_vm1, %vm837_vm2  ;;  %v5058_v60 = vadd.s32 232, %v4772_v3  ;;  %v5063_v61 = vsel %vm868_vm6, 1.0, %v6461_v5  ;;  %vm805_vm12 = vcmp.ge.s32.totalorder %v5047_v57, %v4784_v8 }
  0x1d   :  { %vm886_vm10 = vmand %vm821_vm3, %vm854_vm4  ;;  %6509 = vst [vmem:[#allocation9_spill] sm:$0xff] %v5053_v59  ;;  %v5066_v62 = vsel %vm869_vm9, 1.0, %v6461_v5  ;;  %vm838_vm14 = vcmp.lt.s32.totalorder %v5047_v57, %v4795_v11  ;;  %vm806_vm13 = vcmp.ge.s32.totalorder %v5050_v58, %v4784_v8  ;;  %vm839_vm15 = vcmp.lt.s32.totalorder %v5050_v58, %v4795_v11 }
  0x1e   :  { %vm887_vm11 = vmand %vm822_vm7, %vm855_vm8  ;;  %6510 = vst [vmem:[#allocation10_spill] sm:$0xff] %v5058_v60  ;;  %v5073_v63 = vsel %vm886_vm10, 1.0, %v6461_v5  ;;  %vm823_vm1 = vcmp.ge.s32.totalorder %v5053_v59, %v4784_v8  ;;  %vm856_vm2 = vcmp.lt.s32.totalorder %v5053_v59, %v4795_v11  ;;  %v4551_v1 = vpack.c.bf16 %v5066_v62, %v5063_v61 }
  0x1f   :  { %v5076_v0 = vsel %vm887_vm11, 1.0, %v6461_v5  ;;  %vm870_vm3 = vmand %vm805_vm12, %vm838_vm14  ;;  %vm824_vm4 = vcmp.ge.s32.totalorder %v5058_v60, %v4784_v8  ;;  %vm857_vm6 = vcmp.lt.s32.totalorder %v5058_v60, %v4795_v11  ;;  %v5095_v25 = vadd.s32 96, %v4772_v3 }
  0x20   :  { %4541 = vmatpush3.bf16.xpose.msk.msra.mxu1 %vm4814_vm5, %v4539_v45  ;;  %v4554_v20 = vpack.c.bf16 %v5076_v0, %v5073_v63  ;;  %vm871_vm7 = vmand %vm806_vm13, %vm839_vm15  ;;  %v5098_v29 = vadd.s32 104, %v4772_v3  ;;  %v5101_v35 = vadd.s32 240, %v4772_v3  ;;  %v5106_v36 = vadd.s32 248, %v4772_v3 }
  0x21   :  { %4544 = vmatprep.subr.msk.bf16.mxu1 %vm4814_vm5, %v4542_v46  ;;  %6511 = vst [vmem:[#allocation11_spill] sm:$0xff] %v5095_v25  ;;  %vm888_vm8 = vmand %vm823_vm1, %vm856_vm2  ;;  %v4069_v45 = vsel %vm870_vm3, 1.0, %v6461_v5  ;;  %v4070_v46 = vsel %vm871_vm7, 1.0, %v6461_v5  ;;  %vm807_vm10 = vcmp.ge.s32.totalorder %v5095_v25, %v4784_v8  ;;  %vm840_vm11 = vcmp.lt.s32.totalorder %v5095_v25, %v4795_v11 }
  0x22   :  { %6512 = vst [vmem:[#allocation12_spill] sm:$0xff] %v5098_v29  ;;  %vm889_vm9 = vmand %vm824_vm4, %vm857_vm6  ;;  %vm808_vm12 = vcmp.ge.s32.totalorder %v5098_v29, %v4784_v8  ;;  %vm841_vm14 = vcmp.lt.s32.totalorder %v5098_v29, %v4795_v11  ;;  %vm825_vm13 = vcmp.ge.s32.totalorder %v5101_v35, %v4784_v8  ;;  %vm858_vm15 = vcmp.lt.s32.totalorder %v5101_v35, %v4795_v11 }
  0x23   :  { %6513 = vst [vmem:[#allocation13_spill] sm:$0xff] %v5101_v35  ;;  %6514 = vst [vmem:[#allocation14_spill] sm:$0xff] %v5106_v36  ;;  %vm826_vm2 = vcmp.ge.s32.totalorder %v5106_v36, %v4784_v8  ;;  %vm859_vm3 = vcmp.lt.s32.totalorder %v5106_v36, %v4795_v11  ;;  %v5140_v60 = vadd.s32 120, %v4772_v3  ;;  %v6516_v35 = vmov 0.0  }
  0x24   :  { %vm872_vm1 = vmand %vm807_vm10, %vm840_vm11 }
  0x25   :  { %vm873_vm4 = vmand %vm808_vm12, %vm841_vm14  ;;  %v4071_v36 = vsel %vm872_vm1, 1.0, %v6516_v35  ;;  %vm810_vm10 = vcmp.ge.s32.totalorder %v5140_v60, %v4784_v8  ;;  %vm843_vm11 = vcmp.lt.s32.totalorder %v5140_v60, %v4795_v11 }
  0x26   :  { %vm890_vm6 = vmand %vm825_vm13, %vm858_vm15  ;;  %v4072_v29 = vsel %vm873_vm4, 1.0, %v6516_v35 }
  0x27   :  { %vm891_vm7 = vmand %vm826_vm2, %vm859_vm3  ;;  %v5149_v59 = vsel %vm890_vm6, 1.0, %v6516_v35 }
  0x28   :  { %4547 = vmatpush3.bf16.xpose.msk.msra.mxu1 %vm4814_vm5, %v4545_v55  ;;  %v5117_v55 = vsel %vm888_vm8, 1.0, %v6461_v5  ;;  %v5152_v25 = vsel %vm891_vm7, 1.0, %v6516_v35  ;;  %vm875_vm14 = vmand %vm810_vm10, %vm843_vm11 }
  0x29   :  { %4550 = vmatprep.subr.msk.bf16.mxu1 %vm4814_vm5, %v4548_v56  ;;  %v5120_v56 = vsel %vm889_vm9, 1.0, %v6461_v5  ;;  %v5137_v5 = vadd.s32 112, %v4772_v3 }
  0x2b   :  { %6515 = vst [vmem:[#allocation15_spill] sm:$0xff] %v5137_v5  ;;  %vm809_vm8 = vcmp.ge.s32.totalorder %v5137_v5, %v4784_v8  ;;  %vm842_vm9 = vcmp.lt.s32.totalorder %v5137_v5, %v4795_v11  ;;  %v4074_v8 = vsel %vm875_vm14, 1.0, %v6516_v35 }
  0x2c   :  { %vm874_vm12 = vmand %vm809_vm8, %vm842_vm9 }
  0x2d   :  { %v4073_v5 = vsel %vm874_vm12, 1.0, %v6516_v35 }
  0x2e   :  { %v4569_v50 = vpack.c.bf16 %v4074_v8, %v4073_v5 }
  0x30   :  { %4553 = vmatpush3.bf16.xpose.msk.msra.mxu1 %vm4814_vm5, %v4551_v1  ;;  %v4557_v1 = vpack.c.bf16 %v4070_v46, %v4069_v45 }
  0x31   :  { %4556 = vmatprep.subr.msk.bf16.mxu1 %vm4814_vm5, %v4554_v20  ;;  %v4560_v20 = vpack.c.bf16 %v5120_v56, %v5117_v55 }
  0x38   :  { %4559 = vmatpush3.bf16.xpose.msk.msra.mxu1 %vm4814_vm5, %v4557_v1  ;;  %v4563_v1 = vpack.c.bf16 %v4072_v29, %v4071_v36 }
  0x39   :  { %4562 = vmatprep.subr.msk.bf16.mxu1 %vm4814_vm5, %v4560_v20  ;;  %v4566_v20 = vpack.c.bf16 %v5152_v25, %v5149_v59 }
  0x3f   :  { %178 = vxpose.xlu0.b32.start.end [1/1] (short) %v4769_v2, 128 }
  0x40   :  { %4565 = vmatpush3.bf16.xpose.msk.msra.mxu1 %vm4814_vm5, %v4563_v1 }
  0x41   :  { %4568 = vmatprep.subr.msk.bf16.mxu1 %vm4814_vm5, %v4566_v20 }
  0x48   :  { %4571 = vmatpush3.bf16.xpose.msk.msra.mxu1 %vm4814_vm5, %v4569_v50  ;;  %vm210_vm5 = vcmask 64512   ;;  %v5317_v50 = vadd.s32 32, %v4774_v4 }
  0x4a   :  { %vm1584_vm15 = vcmp.eq.s32.totalorder %v4778_v6, %v5317_v50  ;;  %vm1585_vm4 = vcmp.eq.s32.totalorder %v4781_v7, %v5317_v50  ;;  %vm1586_vm10 = vcmp.eq.s32.totalorder %v4790_v10, %v5317_v50 }
  0x4f   :  { %4402 = vmatmul.mubr.msk.f32.vlgmr.msra.gmra.mrb[0].mxu1 %vm956_vm0, %v4851_v21 }
  0x50   :  { %4403 = vmatprep.mubr.msk.f32.mxu1 %vm956_vm0, %v4858_v22 }
  0x53   :  { %4404 = vmatmul.mubr.msk.f32.gmra.mrb[2].mxu1 %vm956_vm0, %v4858_v22 }
  0x54   :  { %4405 = vmatprep.mubr.msk.f32.mxu1 %vm956_vm0, %v4917_v31 }
  0x57   :  { %4406 = vmatmul.mubr.msk.f32.gmra.mrb[4].mxu1 %vm956_vm0, %v4917_v31 }
  0x58   :  { %4407 = vmatprep.mubr.msk.f32.mxu1 %vm956_vm0, %v4920_v32 }
  0x5b   :  { %4408 = vmatmul.mubr.msk.f32.gmra.mrb[6].mxu1 %vm956_vm0, %v4920_v32 }
  0x5c   :  { %4409 = vmatprep.mubr.msk.f32.mxu1 %vm956_vm0, %v4967_v41 }
  0x5f   :  { %4410 = vmatmul.mubr.msk.f32.gmra.mrb[8].mxu1 %vm956_vm0, %v4967_v41 }
  0x60   :  { %4411 = vmatprep.mubr.msk.f32.mxu1 %vm956_vm0, %v4970_v42 }
  0x63   :  { %4412 = vmatmul.mubr.msk.f32.gmra.mrb[10].mxu1 %vm956_vm0, %v4970_v42 }
  0x64   :  { %4413 = vmatprep.mubr.msk.f32.mxu1 %vm956_vm0, %v5015_v51 }
  0x67   :  { %4414 = vmatmul.mubr.msk.f32.gmra.mrb[12].mxu1 %vm956_vm0, %v5015_v51 }
  0x68   :  { %4415 = vmatprep.mubr.msk.f32.mxu1 %vm956_vm0, %v5018_v52 }
  0x6b   :  { %4416 = vmatmul.mubr.msk.f32.gmra.mrb[14].mxu1 %vm956_vm0, %v5018_v52  ;;  %v5326_v52 = vadd.s32 48, %v4774_v4 }
  0x6c   :  { %4417 = vmatprep.mubr.msk.f32.mxu1 %vm956_vm0, %v5063_v61 }
  0x6d   :  { %vm1713_vm1 = vcmp.eq.s32.totalorder %v4778_v6, %v5326_v52  ;;  %vm1714_vm7 = vcmp.eq.s32.totalorder %v4781_v7, %v5326_v52 }
  0x6f   :  { %4418 = vmatmul.mubr.msk.f32.gmra.mrb[16].mxu1 %vm956_vm0, %v5063_v61 }
  0x70   :  { %4419 = vmatprep.mubr.msk.f32.mxu1 %vm956_vm0, %v5066_v62 }
  0x73   :  { %4420 = vmatmul.mubr.msk.f32.gmra.mrb[18].mxu1 %vm956_vm0, %v5066_v62  ;;  %v5337_v62 = vadd.s32 64, %v4774_v4 }
  0x74   :  { %4421 = vmatprep.mubr.msk.f32.mxu1 %vm956_vm0, %v4069_v45 }
  0x75   :  { %vm1842_vm2 = vcmp.eq.s32.totalorder %v4778_v6, %v5337_v62  ;;  %vm1843_vm9 = vcmp.eq.s32.totalorder %v4781_v7, %v5337_v62 }
  0x77   :  { %4422 = vmatmul.mubr.msk.f32.gmra.mrb[20].mxu1 %vm956_vm0, %v4069_v45 }
  0x78   :  { %4423 = vmatprep.mubr.msk.f32.mxu1 %vm956_vm0, %v4070_v46 }
  0x7b   :  { %4424 = vmatmul.mubr.msk.f32.gmra.mrb[22].mxu1 %vm956_vm0, %v4070_v46 }
  0x7c   :  { %4425 = vmatprep.mubr.msk.f32.mxu1 %vm956_vm0, %v4071_v36 }
  0x7f   :  { %4426 = vmatmul.mubr.msk.f32.gmra.mrb[24].mxu1 %vm956_vm0, %v4071_v36  ;;  %v5345_v36 = vadd.s32 80, %v4774_v4 }
  0x80   :  { %4427 = vmatprep.mubr.msk.f32.mxu1 %vm956_vm0, %v4072_v29 }
  0x81   :  { %vm1971_vm6 = vcmp.eq.s32.totalorder %v4778_v6, %v5345_v36  ;;  %vm1972_vm12 = vcmp.eq.s32.totalorder %v4781_v7, %v5345_v36 }
  0x82   :  { %v162_v2 = vpop.trf.xlu0  ;;  %v4241_v1 = vsel %vm1971_vm6, 1.0, %v6516_v35  ;;  %vm1973_vm6 = vcmp.eq.s32.totalorder %v4790_v10, %v5345_v36 }
  0x83   :  { %4027 = vmatmul.mubr.msk.f32.vlgmr.msra.gmra.mrb[0].mxu0 %vm210_vm5, %v162_v2  ;;  %4428 = vmatmul.mubr.msk.f32.gmra.mrb[26].mxu1 %vm956_vm0, %v4072_v29 }
  0x84   :  { %377 = vmatprep.mubr.f32.mxu0 %v6516_v35  ;;  %4429 = vmatprep.mubr.msk.f32.mxu1 %vm956_vm0, %v4073_v5 }
  0x86   :  { %v163_v11 = vpop.trf.xlu0 }
  0x87   :  { %4028 = vmatmul.mubr.msk.f32.gmra.mrb[2].mxu0 %vm210_vm5, %v163_v11  ;;  %4430 = vmatmul.mubr.msk.f32.gmra.mrb[28].mxu1 %vm956_vm0, %v4073_v5  ;;  %v4214_v11 = vsel %vm1714_vm7, 1.0, %v6516_v35  ;;  %vm1311_vm7 = vcmp.eq.s32.totalorder %v4787_v9, %v4774_v4 }
  0x88   :  { %383 = vmatprep.mubr.f32.mxu0 %v6516_v35  ;;  %4431 = vmatprep.mubr.msk.f32.mxu1 %vm956_vm0, %v4074_v8 }
  0x8a   :  { %v164_v15 = vpop.trf.xlu0 }
  0x8b   :  { %4029 = vmatmul.mubr.msk.f32.gmra.mrb[4].mxu0 %vm210_vm5, %v164_v15  ;;  %4432 = vmatmul.mubr.msk.f32.gmra.mrb[30].mxu1 %vm956_vm0, %v4074_v8 }
  0x8c   :  { %389 = vmatprep.mubr.f32.mxu0 %v6516_v35  ;;  %4433 = vmatprep.mubr.msk.f32.mxu1 %vm956_vm0, %v4829_v16 }
  0x8e   :  { %v165_v21 = vpop.trf.xlu0 }
  0x8f   :  { %4030 = vmatmul.mubr.msk.f32.gmra.mrb[6].mxu0 %vm210_vm5, %v165_v21  ;;  %4434 = vmatmul.mubr.msk.f32.gmra.mrb[32].mxu1 %vm956_vm0, %v4829_v16 }
  0x90   :  { %395 = vmatprep.mubr.f32.mxu0 %v6516_v35  ;;  %4435 = vmatprep.mubr.msk.f32.mxu1 %vm956_vm0, %v4839_v18 }
  0x92   :  { %v166_v5 = vpop.trf.xlu0 }
  0x93   :  { %4031 = vmatmul.mubr.msk.f32.gmra.mrb[8].mxu0 %vm210_vm5, %v166_v5  ;;  %4436 = vmatmul.mubr.msk.f32.gmra.mrb[34].mxu1 %vm956_vm0, %v4839_v18 }
  0x94   :  { %401 = vmatprep.mubr.f32.mxu0 %v6516_v35  ;;  %4437 = vmatprep.mubr.msk.f32.mxu1 %vm956_vm0, %v4884_v26 }
  0x96   :  { %v167_v22 = vpop.trf.xlu0 }
  0x97   :  { %4032 = vmatmul.mubr.msk.f32.gmra.mrb[10].mxu0 %vm210_vm5, %v167_v22  ;;  %4438 = vmatmul.mubr.msk.f32.gmra.mrb[36].mxu1 %vm956_vm0, %v4884_v26  ;;  %v5382_v22 = vadd.s32 128, %v4774_v4 }
  0x98   :  { %407 = vmatprep.mubr.f32.mxu0 %v6516_v35  ;;  %4439 = vmatprep.mubr.msk.f32.mxu1 %vm956_vm0, %v4891_v27 }
  0x99   :  { %vm2358_vm14 = vcmp.eq.s32.totalorder %v4778_v6, %v5382_v22 }
  0x9a   :  { %v168_v16 = vpop.trf.xlu0 }
  0x9b   :  { %4033 = vmatmul.mubr.msk.f32.gmra.mrb[12].mxu0 %vm210_vm5, %v168_v16  ;;  %4440 = vmatmul.mubr.msk.f32.gmra.mrb[38].mxu1 %vm956_vm0, %v4891_v27  ;;  %v4228_v16 = vsel %vm1843_vm9, 1.0, %v6516_v35 }
  0x9c   :  { %413 = vmatprep.mubr.f32.mxu0 %v6516_v35  ;;  %4441 = vmatprep.mubr.msk.f32.mxu1 %vm956_vm0, %v4929_v33 }
  0x9e   :  { %v169_v18 = vpop.trf.xlu0 }
  0x9f   :  { %4034 = vmatmul.mubr.msk.f32.gmra.mrb[14].mxu0 %vm210_vm5, %v169_v18  ;;  %4442 = vmatmul.mubr.msk.f32.gmra.mrb[40].mxu1 %vm956_vm0, %v4929_v33 }
  0xa0   :  { %419 = vmatprep.mubr.f32.mxu0 %v6516_v35  ;;  %4443 = vmatprep.mubr.msk.f32.mxu1 %vm956_vm0, %v4936_v34 }
  0xa2   :  { %v170_v26 = vpop.trf.xlu0 }
  0xa3   :  { %4035 = vmatmul.mubr.msk.f32.gmra.mrb[16].mxu0 %vm210_vm5, %v170_v26  ;;  %4444 = vmatmul.mubr.msk.f32.gmra.mrb[42].mxu1 %vm956_vm0, %v4936_v34 }
  0xa4   :  { %425 = vmatprep.mubr.f32.mxu0 %v6516_v35  ;;  %4445 = vmatprep.mubr.msk.f32.mxu1 %vm956_vm0, %v4977_v43 }
  0xa6   :  { %v171_v27 = vpop.trf.xlu0 }
  0xa7   :  { %4036 = vmatmul.mubr.msk.f32.gmra.mrb[18].mxu0 %vm210_vm5, %v171_v27  ;;  %4446 = vmatmul.mubr.msk.f32.gmra.mrb[44].mxu1 %vm956_vm0, %v4977_v43  ;;  %v4201_v27 = vsel %vm1586_vm10, 1.0, %v6516_v35  ;;  %vm1312_vm10 = vcmp.eq.s32.totalorder %v4803_v13, %v4774_v4 }
  0xa8   :  { %431 = vmatprep.mubr.f32.mxu0 %v6516_v35  ;;  %4447 = vmatprep.mubr.msk.f32.mxu1 %vm956_vm0, %v4980_v44 }
  0xaa   :  { %v172_v31 = vpop.trf.xlu0 }
  0xab   :  { %4037 = vmatmul.mubr.msk.f32.gmra.mrb[20].mxu0 %vm210_vm5, %v172_v31  ;;  %4448 = vmatmul.mubr.msk.f32.gmra.mrb[46].mxu1 %vm956_vm0, %v4980_v44  ;;  %v5314_v44 = vadd.s32 16, %v4774_v4 }
  0xac   :  { %437 = vmatprep.mubr.f32.mxu0 %v6516_v35  ;;  %4449 = vmatprep.mubr.msk.f32.mxu1 %vm956_vm0, %v5025_v53 }
  0xad   :  { %vm1455_vm13 = vcmp.eq.s32.totalorder %v4778_v6, %v5314_v44  ;;  %vm1456_vm3 = vcmp.eq.s32.totalorder %v4781_v7, %v5314_v44 }
  0xae   :  { %v173_v32 = vpop.trf.xlu0  ;;  %v4186_v45 = vsel %vm1456_vm3, 1.0, %v6516_v35  ;;  %vm2359_vm3 = vcmp.eq.s32.totalorder %v4781_v7, %v5382_v22 }
  0xaf   :  { %4038 = vmatmul.mubr.msk.f32.gmra.mrb[22].mxu0 %vm210_vm5, %v173_v32  ;;  %4450 = vmatmul.mubr.msk.f32.gmra.mrb[48].mxu1 %vm956_vm0, %v5025_v53  ;;  %v4185_v53 = vsel %vm1455_vm13, 1.0, %v6516_v35 }
  0xb0   :  { %443 = vmatprep.mubr.f32.mxu0 %v6516_v35  ;;  %4451 = vmatprep.mubr.msk.f32.mxu1 %vm956_vm0, %v5028_v54 }
  0xb2   :  { %v174_v33 = vpop.trf.xlu0 }
  0xb3   :  { %4039 = vmatmul.mubr.msk.f32.gmra.mrb[24].mxu0 %vm210_vm5, %v174_v33  ;;  %4452 = vmatmul.mubr.msk.f32.gmra.mrb[50].mxu1 %vm956_vm0, %v5028_v54  ;;  %v4199_v54 = vsel %vm1584_vm15, 1.0, %v6516_v35  ;;  %v4242_v33 = vsel %vm1972_vm12, 1.0, %v6516_v35  ;;  %vm1715_vm15 = vcmp.eq.s32.totalorder %v4790_v10, %v5326_v52  ;;  %vm2360_vm12 = vcmp.eq.s32.totalorder %v4790_v10, %v5382_v22 }
  0xb4   :  { %449 = vmatprep.mubr.f32.mxu0 %v6516_v35  ;;  %4453 = vmatprep.mubr.msk.f32.mxu1 %vm956_vm0, %v5073_v63  ;;  %v1680_v61 = vadd.f32 %v4199_v54, %v4185_v53 }
  0xb6   :  { %v175_v34 = vpop.trf.xlu0 }
  0xb7   :  { %4040 = vmatmul.mubr.msk.f32.gmra.mrb[26].mxu0 %vm210_vm5, %v175_v34  ;;  %4454 = vmatmul.mubr.msk.f32.gmra.mrb[52].mxu1 %vm956_vm0, %v5073_v63  ;;  %v4213_v63 = vsel %vm1713_vm1, 1.0, %v6516_v35  ;;  %v4283_v34 = vsel %vm2358_vm14, 1.0, %v6516_v35  ;;  %vm1310_vm1 = vcmp.eq.s32.totalorder %v4772_v3, %v4774_v4 }
  0xb8   :  { %455 = vmatprep.mubr.f32.mxu0 %v6516_v35  ;;  %4455 = vmatprep.mubr.msk.f32.mxu1 %vm956_vm0, %v5076_v0  ;;  %v1809_v29 = vadd.f32 %v4213_v63, %v1680_v61 }
  0xba   :  { %v176_v41 = vpop.trf.xlu0 }
  0xbb   :  { %4041 = vmatmul.mubr.msk.f32.gmra.mrb[28].mxu0 %vm210_vm5, %v176_v41  ;;  %4456 = vmatmul.mubr.msk.f32.gmra.mrb[54].mxu1 %vm956_vm0, %v5076_v0 }
  0xbc   :  { %461 = vmatprep.mubr.f32.mxu0 %v6516_v35  ;;  %4457 = vmatprep.mubr.msk.f32.mxu1 %vm956_vm0, %v5117_v55 }
  0xbe   :  { %v177_v42 = vpop.trf.xlu0 }
  0xbf   :  { %4042 = vmatmul.mubr.msk.f32.gmra.mrb[30].mxu0 %vm210_vm5, %v177_v42  ;;  %4458 = vmatmul.mubr.msk.f32.gmra.mrb[56].mxu1 %vm956_vm0, %v5117_v55  ;;  %v5360_v55 = vadd.s32 96, %v4774_v4 }
  0xc0   :  { %467 = vmatprep.mubr.f32.mxu0 %v6516_v35  ;;  %4459 = vmatprep.mubr.msk.f32.mxu1 %vm956_vm0, %v5120_v56 }
  0xc1   :  { %vm2100_vm8 = vcmp.eq.s32.totalorder %v4778_v6, %v5360_v55  ;;  %vm2101_vm13 = vcmp.eq.s32.totalorder %v4781_v7, %v5360_v55 }
  0xc2   :  { %v194_v43 = vpop.trf.xlu0  ;;  %v4255_v15 = vsel %vm2100_vm8, 1.0, %v6516_v35  ;;  %v4256_v42 = vsel %vm2101_vm13, 1.0, %v6516_v35  ;;  %vm2102_vm8 = vcmp.eq.s32.totalorder %v4790_v10, %v5360_v55  ;;  %vm1587_vm13 = vcmp.eq.s32.totalorder %v4798_v12, %v5317_v50 }
  0xc3   :  { %4043 = vmatmul.mubr.msk.f32.gmra.mrb[32].mxu0 %vm210_vm5, %v194_v43  ;;  %4460 = vmatmul.mubr.msk.f32.gmra.mrb[58].mxu1 %vm956_vm0, %v5120_v56  ;;  %v4200_v56 = vsel %vm1585_vm4, 1.0, %v6516_v35  ;;  %v4215_v43 = vsel %vm1715_vm15, 1.0, %v6516_v35  ;;  %vm1844_vm4 = vcmp.eq.s32.totalorder %v4790_v10, %v5337_v62  ;;  %vm1716_vm15 = vcmp.eq.s32.totalorder %v4798_v12, %v5326_v52 }
  0xc4   :  { %473 = vmatprep.mubr.f32.mxu0 %v6516_v35  ;;  %4461 = vmatprep.mubr.msk.f32.mxu1 %vm956_vm0, %v5149_v59  ;;  %v1681_v20 = vadd.f32 %v4200_v56, %v4186_v45  ;;  %v1811_v61 = vadd.f32 %v4215_v43, %v4201_v27  ;;  %v4229_v45 = vsel %vm1844_vm4, 1.0, %v6516_v35  ;;  %v5432_v56 = vadd.s32 144, %v4774_v4 }
  0xc5   :  { %vm1313_vm4 = vcmp.eq.s32.totalorder %v4806_v14, %v4774_v4 }
  0xc6   :  { %v195_v51 = vpop.trf.xlu0  ;;  %v1810_v21 = vadd.f32 %v4214_v11, %v1681_v20  ;;  %vm2489_vm14 = vcmp.eq.s32.totalorder %v4790_v10, %v5432_v56 }
  0xc7   :  { %4044 = vmatmul.mubr.msk.f32.gmra.mrb[34].mxu0 %vm210_vm5, %v195_v51  ;;  %4462 = vmatmul.mubr.msk.f32.gmra.mrb[60].mxu1 %vm956_vm0, %v5149_v59  ;;  %v4227_v59 = vsel %vm1842_vm2, 1.0, %v6516_v35  ;;  %v5411_v51 = vsel %vm1310_vm1, 1.0, %v6516_v35  ;;  %v4299_v27 = vsel %vm2489_vm14, 1.0, %v6516_v35  ;;  %vm1572_vm14 = vcmp.eq.s32.totalorder %v4866_v23, %v5317_v50 }
  0xc8   :  { %479 = vmatprep.mubr.f32.mxu0 %v6516_v35  ;;  %4463 = vmatprep.mubr.msk.f32.mxu1 %vm956_vm0, %v5152_v25  ;;  %v1938_v46 = vadd.f32 %v4227_v59, %v1809_v29  ;;  %v1939_v26 = vadd.f32 %v4228_v16, %v1810_v21  ;;  %6517 = vst [vmem:[#allocation16_spill] sm:$0xff] %v5411_v51  ;;  %v4284_v59 = vsel %vm2359_vm3, 1.0, %v6516_v35  ;;  %vm5473_vm3 = vmpackc.low %vm1311_vm7, %vm1310_vm1 }
  0xc9   :  { %vm1974_vm1 = vcmp.eq.s32.totalorder %v4798_v12, %v5345_v36 }
  0xca   :  { %v196_v0 = vpop.trf.xlu0  ;;  %v2067_v2 = vadd.f32 %v4241_v1, %v1938_v46  ;;  %v2068_v41 = vadd.f32 %v4242_v33, %v1939_v26  ;;  %v4243_v46 = vsel %vm1973_vm6, 1.0, %v6516_v35  ;;  %v4156_v1 = vsel %vm1311_vm7, 1.0, %v6516_v35 }
  0xcb   :  { %4045 = vmatmul.mubr.msk.f32.gmra.mrb[36].mxu0 %vm210_vm5, %v196_v0  ;;  %4464 = vmatmul.mubr.msk.f32.gmra.mrb[62].mxu1 %vm956_vm0, %v5152_v25  ;;  %v5369_v25 = vadd.s32 112, %v4774_v4  ;;  %vm1442_vm6 = vcmp.eq.s32.totalorder %v4806_v14, %v5314_v44  ;;  %v4202_v33 = vsel %vm1587_vm13, 1.0, %v6516_v35  ;;  %v4244_v14 = vsel %vm1974_vm1, 1.0, %v6516_v35 }
  0xcc   :  { %485 = vmatprep.mubr.f32.mxu0 %v6516_v35  ;;  %v2196_v5 = vadd.f32 %v4255_v15, %v2067_v2  ;;  %v2197_v53 = vadd.f32 %v4256_v42, %v2068_v41  ;;  %v4172_v41 = vsel %vm1442_vm6, 1.0, %v6516_v35  ;;  %v4216_v42 = vsel %vm1716_vm15, 1.0, %v6516_v35 }
  0xcd   :  { %vm2229_vm11 = vcmp.eq.s32.totalorder %v4778_v6, %v5369_v25  ;;  %vm2230_vm2 = vcmp.eq.s32.totalorder %v4781_v7, %v5369_v25  ;;  %v1940_v7 = vadd.f32 %v4229_v45, %v1811_v61  ;;  %vm2231_vm9 = vcmp.eq.s32.totalorder %v4790_v10, %v5369_v25 }
  0xce   :  { %v197_v8 = vpop.trf.xlu0  ;;  %v4269_v18 = vsel %vm2229_vm11, 1.0, %v6516_v35  ;;  %v4270_v54 = vsel %vm2230_vm2, 1.0, %v6516_v35  ;;  %vm1441_vm11 = vcmp.eq.s32.totalorder %v4803_v13, %v5314_v44  ;;  %v4271_v15 = vsel %vm2231_vm9, 1.0, %v6516_v35 }
  0xcf   :  { %4046 = vmatmul.mubr.msk.f32.gmra.mrb[38].mxu0 %vm210_vm5, %v197_v8  ;;  %v2325_v32 = vadd.f32 %v4269_v18, %v2196_v5  ;;  %v2326_v29 = vadd.f32 %v4270_v54, %v2197_v53  ;;  %v4257_v8 = vsel %vm2102_vm8, 1.0, %v6516_v35  ;;  %v2069_v11 = vadd.f32 %v4243_v46, %v1940_v7 }
  0xd0   :  { %491 = vmatprep.mubr.f32.mxu0 %v6516_v35  ;;  %v4157_v5 = vsel %vm1312_vm10, 1.0, %v6516_v35  ;;  %v4171_v16 = vsel %vm1441_vm11, 1.0, %v6516_v35  ;;  %v4285_v13 = vsel %vm2360_vm12, 1.0, %v6516_v35  ;;  %vm1845_vm2 = vcmp.eq.s32.totalorder %v4798_v12, %v5337_v62 }
  0xd1   :  { %v5402_v6 = vadd.f32 %v4283_v34, %v2325_v32  ;;  %v5438_v20 = vadd.f32 %v4284_v59, %v2326_v29  ;;  %v5455_v18 = vadd.f32 %v4171_v16, %v4157_v5  ;;  %v2198_v26 = vadd.f32 %v4257_v8, %v2069_v11 }
  0xd2   :  { %v198_v31 = vpop.trf.xlu0  ;;  %v6519_v10 = vmov 0  ;;  %v4158_v34 = vsel %vm1313_vm4, 1.0, %v6516_v35  ;;  %v4230_v43 = vsel %vm1845_vm2, 1.0, %v6516_v35  ;;  %v1812_v61 = vadd.f32 %v4216_v42, %v4202_v33 }
  0xd3   :  { %4047 = vmatmul.mubr.msk.f32.gmra.mrb[40].mxu0 %vm210_vm5, %v198_v31  ;;  %v4674_v0 = vpack.i.bf16 %v5411_v51, %v5402_v6  ;;  %v4676_v21 = vpack.i.bf16 %v4156_v1, %v5438_v20  ;;  %6518 = vst [vmem:[#allocation17_spill] sm:$0xff] %v5455_v18  ;;  %v6520_v10 = vsel %vm5473_vm3, 4294967295, %v6519_v10  ;;  %v2327_v32 = vadd.f32 %v4271_v15, %v2198_v26 }
  0xd4   :  { %497 = vmatprep.mubr.f32.mxu0 %v6516_v35  ;;  %6521 = vst [vmem:[#allocation18_spill] sm:$0xff] %v6520_v10  ;;  %v5488_v54 = vadd.f32 %v4172_v41, %v4158_v34  ;;  %vm2103_vm7 = vcmp.eq.s32.totalorder %v4798_v12, %v5360_v55  ;;  %vm2232_vm8 = vcmp.eq.s32.totalorder %v4798_v12, %v5369_v25  ;;  %v4187_v16 = vsel %vm1572_vm14, 1.0, %v6516_v35 }
  0xd5   :  { %4675 = vxpose.xlu1.b32.start [1/16] (narrow) %v4674_v0, 16  ;;  %v2456_v53 = vadd.f32 %v4285_v13, %v2327_v32  ;;  %vm2361_vm9 = vcmp.eq.s32.totalorder %v4798_v12, %v5382_v22  ;;  %v1941_v29 = vadd.f32 %v4230_v43, %v1812_v61  ;;  %v4258_v59 = vsel %vm2103_vm7, 1.0, %v6516_v35 }
  0xd6   :  { %v199_v63 = vpop.trf.xlu0  ;;  %6522 = vst [vmem:[#allocation19_spill] sm:$0xff] %v5488_v54  ;;  %v4272_v45 = vsel %vm2232_vm8, 1.0, %v6516_v35  ;;  %v4286_v46 = vsel %vm2361_vm9, 1.0, %v6516_v35  ;;  %vm2490_vm10 = vcmp.eq.s32.totalorder %v4798_v12, %v5432_v56  ;;  %vm1314_vm11 = vcmp.eq.s32.totalorder %v4866_v23, %v4774_v4 }
  0xd7   :  { %4048 = vmatmul.mubr.msk.f32.gmra.mrb[42].mxu0 %vm210_vm5, %v199_v63  ;;  %v5499_v0 = vadd.f32 %v4299_v27, %v2456_v53  ;;  %vm1443_vm12 = vcmp.eq.s32.totalorder %v4866_v23, %v5314_v44  ;;  %v2070_v1 = vadd.f32 %v4244_v14, %v1941_v29  ;;  %v4300_v8 = vsel %vm2490_vm10, 1.0, %v6516_v35 }
  0xd8   :  { %503 = vmatprep.mubr.f32.mxu0 %v6516_v35  ;;  %v4173_v11 = vsel %vm1443_vm12, 1.0, %v6516_v35  ;;  %vm1717_vm13 = vcmp.eq.s32.totalorder %v4836_v17, %v5326_v52  ;;  %vm1846_vm15 = vcmp.eq.s32.totalorder %v4836_v17, %v5337_v62  ;;  %vm1975_vm2 = vcmp.eq.s32.totalorder %v4836_v17, %v5345_v36 }
  0xd9   :  { %4677 = vxpose.xlu1.b32.cont [2/16] (narrow) %v4676_v21, 16  ;;  %v4678_v7 = vpack.i.bf16 %v5455_v18, %v5499_v0  ;;  %v2199_v15 = vadd.f32 %v4258_v59, %v2070_v1  ;;  %v4217_v26 = vsel %vm1717_vm13, 1.0, %v6516_v35  ;;  %v4231_v23 = vsel %vm1846_vm15, 1.0, %v6516_v35 }
  0xda   :  { %v200_v2 = vpop.trf.xlu0  ;;  %vm2104_vm4 = vcmp.eq.s32.totalorder %v4836_v17, %v5360_v55  ;;  %v4245_v32 = vsel %vm1975_vm2, 1.0, %v6516_v35  ;;  %vm2233_vm6 = vcmp.eq.s32.totalorder %v4836_v17, %v5369_v25  ;;  %vm2362_vm1 = vcmp.eq.s32.totalorder %v4836_v17, %v5382_v22 }
  0xdb   :  { %4049 = vmatmul.mubr.msk.f32.gmra.mrb[44].mxu0 %vm210_vm5, %v200_v2  ;;  %v4159_v2 = vsel %vm1314_vm11, 1.0, %v6516_v35  ;;  %v2328_v13 = vadd.f32 %v4272_v45, %v2199_v15  ;;  %v4259_v33 = vsel %vm2104_vm4, 1.0, %v6516_v35  ;;  %vm2491_vm7 = vcmp.eq.s32.totalorder %v4836_v17, %v5432_v56 }
  0xdc   :  { %509 = vmatprep.mubr.f32.mxu0 %v6516_v35  ;;  %v1539_v5 = vadd.f32 %v4173_v11, %v4159_v2  ;;  %v4273_v43 = vsel %vm2233_vm6, 1.0, %v6516_v35  ;;  %v4287_v53 = vsel %vm2362_vm1, 1.0, %v6516_v35  ;;  %v4301_v61 = vsel %vm2491_vm7, 1.0, %v6516_v35 }
  0xdd   :  { %4679 = vxpose.xlu1.b32.cont [3/16] (narrow) %v4678_v7, 16  ;;  %v2457_v41 = vadd.f32 %v4286_v46, %v2328_v13  ;;  %v5549_v14 = vadd.s32 160, %v4774_v4  ;;  %vm1315_vm8 = vcmp.eq.s32.totalorder %v4869_v24, %v4774_v4  ;;  %vm1444_vm9 = vcmp.eq.s32.totalorder %v4869_v24, %v5314_v44 }
  0xde   :  { %v201_v31 = vpop.trf.xlu0  ;;  %v5534_v27 = vadd.f32 %v4187_v16, %v1539_v5  ;;  %v4160_v59 = vsel %vm1315_vm8, 1.0, %v6516_v35  ;;  %v4174_v45 = vsel %vm1444_vm9, 1.0, %v6516_v35  ;;  %vm1573_vm11 = vcmp.eq.s32.totalorder %v4869_v24, %v5317_v50 }
  0xdf   :  { %4050 = vmatmul.mubr.msk.f32.gmra.mrb[46].mxu0 %vm210_vm5, %v201_v31  ;;  %v1942_v31 = vadd.f32 %v4231_v23, %v4217_v26  ;;  %vm2620_vm10 = vcmp.eq.s32.totalorder %v4836_v17, %v5549_v14  ;;  %v1540_v46 = vadd.f32 %v4174_v45, %v4160_v59  ;;  %vm1718_vm12 = vcmp.eq.s32.totalorder %v4846_v19, %v5326_v52 }
  0xe0   :  { %515 = vmatprep.mubr.f32.mxu0 %v6516_v35  ;;  %6523 = vst [vmem:[#allocation20_spill] sm:$0xff] %v5534_v27  ;;  %v4313_v2 = vsel %vm2620_vm10, 1.0, %v6516_v35  ;;  %v4188_v11 = vsel %vm1573_vm11, 1.0, %v6516_v35  ;;  %v4218_v17 = vsel %vm1718_vm12, 1.0, %v6516_v35  ;;  %vm1847_vm14 = vcmp.eq.s32.totalorder %v4846_v19, %v5337_v62 }
  0xe1   :  { %v2071_v42 = vadd.f32 %v4245_v32, %v1942_v31  ;;  %vm1976_vm13 = vcmp.eq.s32.totalorder %v4846_v19, %v5345_v36  ;;  %v4232_v15 = vsel %vm1847_vm14, 1.0, %v6516_v35  ;;  %vm2105_vm15 = vcmp.eq.s32.totalorder %v4846_v19, %v5360_v55 }
  0xe2   :  { %v202_v63 = vpop.trf.xlu0  ;;  %v4246_v5 = vsel %vm1976_vm13, 1.0, %v6516_v35  ;;  %v1943_v16 = vadd.f32 %v4232_v15, %v4218_v17  ;;  %v4260_v26 = vsel %vm2105_vm15, 1.0, %v6516_v35  ;;  %vm2234_vm2 = vcmp.eq.s32.totalorder %v4846_v19, %v5369_v25 }
  0xe3   :  { %4051 = vmatmul.mubr.msk.f32.gmra.mrb[48].mxu0 %vm210_vm5, %v202_v63  ;;  %v5556_v63 = vadd.f32 %v4300_v8, %v2457_v41  ;;  %v2200_v29 = vadd.f32 %v4259_v33, %v2071_v42  ;;  %vm2363_vm4 = vcmp.eq.s32.totalorder %v4846_v19, %v5382_v22  ;;  %v4274_v31 = vsel %vm2234_vm2, 1.0, %v6516_v35 }
  0xe4   :  { %521 = vmatprep.mubr.f32.mxu0 %v6516_v35  ;;  %v4288_v32 = vsel %vm2363_vm4, 1.0, %v6516_v35  ;;  %vm2492_vm6 = vcmp.eq.s32.totalorder %v4846_v19, %v5432_v56  ;;  %v2072_v33 = vadd.f32 %v4246_v5, %v1943_v16  ;;  %vm2621_vm1 = vcmp.eq.s32.totalorder %v4846_v19, %v5549_v14 }
  0xe5   :  { %6524 = vst [vmem:[#allocation21_spill] sm:$0xff] %v5556_v63  ;;  %v4680_v1 = vpack.i.bf16 %v5488_v54, %v5556_v63  ;;  %v2329_v8 = vadd.f32 %v4273_v43, %v2200_v29  ;;  %v4314_v43 = vsel %vm2621_vm1, 1.0, %v6516_v35  ;;  %vm1316_vm7 = vcmp.eq.s32.totalorder %v4951_v37, %v4774_v4 }
  0xe6   :  { %v203_v12 = vpop.trf.xlu0  ;;  %vm1445_vm8 = vcmp.eq.s32.totalorder %v4951_v37, %v5314_v44  ;;  %vm1574_vm9 = vcmp.eq.s32.totalorder %v4951_v37, %v5317_v50  ;;  %vm1703_vm10 = vcmp.eq.s32.totalorder %v4951_v37, %v5326_v52  ;;  %vm1848_vm11 = vcmp.eq.s32.totalorder %v4901_v28, %v5337_v62 }
  0xe7   :  { %4052 = vmatmul.mubr.msk.f32.gmra.mrb[50].mxu0 %vm210_vm5, %v203_v12  ;;  %v5571_v12 = vadd.f32 %v4188_v11, %v1540_v46  ;;  %4681 = vxpose.xlu1.b32.cont [4/16] (narrow) %v4680_v1, 16  ;;  %v2458_v24 = vadd.f32 %v4287_v53, %v2329_v8  ;;  %v2201_v53 = vadd.f32 %v4260_v26, %v2072_v33  ;;  %v4175_v19 = vsel %vm1445_vm8, 1.0, %v6516_v35 }
  0xe8   :  { %527 = vmatprep.mubr.f32.mxu0 %v6516_v35  ;;  %v4189_v46 = vsel %vm1574_vm9, 1.0, %v6516_v35  ;;  %v4203_v1 = vsel %vm1703_vm10, 1.0, %v6516_v35  ;;  %vm1977_vm12 = vcmp.eq.s32.totalorder %v4901_v28, %v5345_v36  ;;  %vm2106_vm14 = vcmp.eq.s32.totalorder %v4901_v28, %v5360_v55 }
  0xe9   :  { %6525 = vst [vmem:[#allocation22_spill] sm:$0xff] %v5571_v12  ;;  %v2587_v13 = vadd.f32 %v4301_v61, %v2458_v24  ;;  %v4161_v61 = vsel %vm1316_vm7, 1.0, %v6516_v35  ;;  %v4247_v11 = vsel %vm1977_vm12, 1.0, %v6516_v35  ;;  %v4261_v24 = vsel %vm2106_vm14, 1.0, %v6516_v35 }
  0xea   :  { %v204_v34 = vpop.trf.xlu0  ;;  %v1541_v45 = vadd.f32 %v4175_v19, %v4161_v61  ;;  %vm2235_vm13 = vcmp.eq.s32.totalorder %v4901_v28, %v5369_v25  ;;  %vm2364_vm15 = vcmp.eq.s32.totalorder %v4901_v28, %v5382_v22  ;;  %vm2493_vm2 = vcmp.eq.s32.totalorder %v4901_v28, %v5432_v56 }
  0xeb   :  { %4053 = vmatmul.mubr.msk.f32.gmra.mrb[52].mxu0 %vm210_vm5, %v204_v34  ;;  %v4302_v34 = vsel %vm2492_vm6, 1.0, %v6516_v35  ;;  %v5599_v42 = vadd.f32 %v4313_v2, %v2587_v13  ;;  %v4233_v2 = vsel %vm1848_vm11, 1.0, %v6516_v35  ;;  %v4275_v16 = vsel %vm2235_vm13, 1.0, %v6516_v35 }
  0xec   :  { %533 = vmatprep.mubr.f32.mxu0 %v6516_v35  ;;  %v1670_v8 = vadd.f32 %v4189_v46, %v1541_v45  ;;  %v2073_v17 = vadd.f32 %v4247_v11, %v4233_v2  ;;  %v4289_v13 = vsel %vm2364_vm15, 1.0, %v6516_v35  ;;  %vm2622_vm4 = vcmp.eq.s32.totalorder %v4901_v28, %v5549_v14 }
  0xed   :  { %6526 = vst [vmem:[#allocation23_spill] sm:$0xff] %v5599_v42  ;;  %v4682_v59 = vpack.i.bf16 %v5534_v27, %v5599_v42  ;;  %vm1317_vm6 = vcmp.eq.s32.totalorder %v4954_v38, %v4774_v4  ;;  %vm1446_vm1 = vcmp.eq.s32.totalorder %v4954_v38, %v5314_v44  ;;  %vm1575_vm8 = vcmp.eq.s32.totalorder %v4954_v38, %v5317_v50 }
  0xee   :  { %v205_v7 = vpop.trf.xlu0  ;;  %v5629_v5 = vadd.f32 %v4203_v1, %v1670_v8  ;;  %v4162_v61 = vsel %vm1317_vm6, 1.0, %v6516_v35  ;;  %vm1704_vm9 = vcmp.eq.s32.totalorder %v4954_v38, %v5326_v52  ;;  %vm1849_vm10 = vcmp.eq.s32.totalorder %v4914_v30, %v5337_v62 }
  0xef   :  { %4054 = vmatmul.mubr.msk.f32.gmra.mrb[54].mxu0 %vm210_vm5, %v205_v7  ;;  %v2330_v7 = vadd.f32 %v4274_v31, %v2201_v53  ;;  %4683 = vxpose.xlu1.b32.cont [5/16] (narrow) %v4682_v59, 16  ;;  %v4303_v31 = vsel %vm2493_vm2, 1.0, %v6516_v35  ;;  %v4315_v53 = vsel %vm2622_vm4, 1.0, %v6516_v35  ;;  %vm1978_vm11 = vcmp.eq.s32.totalorder %v4914_v30, %v5345_v36 }
  0xf0   :  { %539 = vmatprep.mubr.f32.mxu0 %v6516_v35  ;;  %6527 = vst [vmem:[#allocation24_spill] sm:$0xff] %v5629_v5  ;;  %v4234_v8 = vsel %vm1849_vm10, 1.0, %v6516_v35  ;;  %v4248_v2 = vsel %vm1978_vm11, 1.0, %v6516_v35  ;;  %vm2107_vm12 = vcmp.eq.s32.totalorder %v4914_v30, %v5360_v55  ;;  %vm2236_vm14 = vcmp.eq.s32.totalorder %v4914_v30, %v5369_v25 }
  0xf1   :  { %v2459_v37 = vadd.f32 %v4288_v32, %v2330_v7  ;;  %v5643_v32 = vadd.s32 176, %v4774_v4  ;;  %v4190_v7 = vsel %vm1575_vm8, 1.0, %v6516_v35  ;;  %v2074_v11 = vadd.f32 %v4248_v2, %v4234_v8 }
  0xf2   :  { %v206_v23 = vpop.trf.xlu0  ;;  %vm2365_vm13 = vcmp.eq.s32.totalorder %v4914_v30, %v5382_v22  ;;  %vm2494_vm15 = vcmp.eq.s32.totalorder %v4914_v30, %v5432_v56  ;;  %vm2623_vm2 = vcmp.eq.s32.totalorder %v4914_v30, %v5549_v14  ;;  %vm1318_vm6 = vcmp.eq.s32.totalorder %v4999_v47, %v4774_v4 }
  0xf3   :  { %4055 = vmatmul.mubr.msk.f32.gmra.mrb[56].mxu0 %vm210_vm5, %v206_v23  ;;  %v2588_v26 = vadd.f32 %v4302_v34, %v2459_v37  ;;  %v2202_v23 = vadd.f32 %v4261_v24, %v2073_v17  ;;  %vm2751_vm7 = vcmp.eq.s32.totalorder %v4901_v28, %v5643_v32  ;;  %v4204_v28 = vsel %vm1704_vm9, 1.0, %v6516_v35 }
  0xf4   :  { %545 = vmatprep.mubr.f32.mxu0 %v6516_v35  ;;  %v4325_v45 = vsel %vm2751_vm7, 1.0, %v6516_v35  ;;  %v4262_v24 = vsel %vm2107_vm12, 1.0, %v6516_v35  ;;  %vm2752_vm4 = vcmp.eq.s32.totalorder %v4914_v30, %v5643_v32  ;;  %vm1576_vm7 = vcmp.eq.s32.totalorder %v4999_v47, %v5317_v50 }
  0xf5   :  { %v5649_v33 = vadd.f32 %v4314_v43, %v2588_v26  ;;  %v2331_v34 = vadd.f32 %v4275_v16, %v2202_v23  ;;  %v2203_v16 = vadd.f32 %v4262_v24, %v2074_v11  ;;  %v4290_v26 = vsel %vm2365_vm13, 1.0, %v6516_v35 }
  0xf6   :  { %v207_v29 = vpop.trf.xlu0  ;;  %vm1705_vm8 = vcmp.eq.s32.totalorder %v4999_v47, %v5326_v52  ;;  %vm1834_vm9 = vcmp.eq.s32.totalorder %v4999_v47, %v5337_v62  ;;  %vm1979_vm10 = vcmp.eq.s32.totalorder %v4957_v39, %v5345_v36  ;;  %vm2108_vm11 = vcmp.eq.s32.totalorder %v4957_v39, %v5360_v55 }
  0xf7   :  { %4056 = vmatmul.mubr.msk.f32.gmra.mrb[58].mxu0 %vm210_vm5, %v207_v29  ;;  %6528 = vst [vmem:[#allocation25_spill] sm:$0xff] %v5649_v33  ;;  %v4176_v29 = vsel %vm1446_vm1, 1.0, %v6516_v35  ;;  %v4684_v43 = vpack.i.bf16 %v5571_v12, %v5649_v33  ;;  %v2460_v59 = vadd.f32 %v4289_v13, %v2331_v34  ;;  %v4304_v13 = vsel %vm2494_vm15, 1.0, %v6516_v35 }
  0xf8   :  { %551 = vmatprep.mubr.f32.mxu0 %v6516_v35  ;;  %v1542_v46 = vadd.f32 %v4176_v29, %v4162_v61  ;;  %v4163_v29 = vsel %vm1318_vm6, 1.0, %v6516_v35  ;;  %vm1447_vm1 = vcmp.eq.s32.totalorder %v4999_v47, %v5314_v44  ;;  %v4263_v8 = vsel %vm2108_vm11, 1.0, %v6516_v35 }
  0xf9   :  { %4685 = vxpose.xlu1.b32.cont [6/16] (narrow) %v4684_v43, 16  ;;  %v2589_v38 = vadd.f32 %v4303_v31, %v2460_v59  ;;  %v4316_v31 = vsel %vm2623_vm2, 1.0, %v6516_v35  ;;  %v4177_v43 = vsel %vm1447_vm1, 1.0, %v6516_v35  ;;  %v4191_v59 = vsel %vm1576_vm7, 1.0, %v6516_v35 }
  0xfa   :  { %v208_v15 = vpop.trf.xlu0  ;;  %v1671_v1 = vadd.f32 %v4190_v7, %v1542_v46  ;;  %v4205_v46 = vsel %vm1705_vm8, 1.0, %v6516_v35  ;;  %vm2237_vm12 = vcmp.eq.s32.totalorder %v4957_v39, %v5369_v25  ;;  %vm2495_vm13 = vcmp.eq.s32.totalorder %v4957_v39, %v5432_v56 }
  0xfb   :  { %4057 = vmatmul.mubr.msk.f32.gmra.mrb[60].mxu0 %vm210_vm5, %v208_v15  ;;  %v2718_v37 = vadd.f32 %v4315_v53, %v2589_v38  ;;  %v4276_v15 = vsel %vm2236_vm14, 1.0, %v6516_v35  ;;  %v4326_v53 = vsel %vm2752_vm4, 1.0, %v6516_v35  ;;  %v4249_v38 = vsel %vm1979_vm10, 1.0, %v6516_v35 }
  0xfc   :  { %557 = vmatprep.mubr.f32.mxu0 %v6516_v35  ;;  %v5678_v17 = vadd.f32 %v4204_v28, %v1671_v1  ;;  %v2332_v34 = vadd.f32 %v4276_v15, %v2203_v16  ;;  %v4219_v28 = vsel %vm1834_vm9, 1.0, %v6516_v35  ;;  %vm2366_vm14 = vcmp.eq.s32.totalorder %v4957_v39, %v5382_v22 }
  0xfd   :  { %v5687_v23 = vadd.f32 %v4325_v45, %v2718_v37  ;;  %v1543_v45 = vadd.f32 %v4177_v43, %v4163_v29  ;;  %v2204_v2 = vadd.f32 %v4263_v8, %v4249_v38  ;;  %v4277_v11 = vsel %vm2237_vm12, 1.0, %v6516_v35 }
  0xfe   :  { %v209_v19 = vpop.trf.xlu0  ;;  %6529 = vst [vmem:[#allocation26_spill] sm:$0xff] %v5678_v17  ;;  %v2461_v30 = vadd.f32 %v4290_v26, %v2332_v34  ;;  %v4291_v37 = vsel %vm2366_vm14, 1.0, %v6516_v35  ;;  %vm2624_vm15 = vcmp.eq.s32.totalorder %v4957_v39, %v5549_v14  ;;  %vm2753_vm2 = vcmp.eq.s32.totalorder %v4957_v39, %v5643_v32 }
  0xff   :  { %4058 = vmatmul.mubr.msk.f32.gmra.mrb[62].mxu0 %vm210_vm5, %v209_v19  ;;  %6530 = vst [vmem:[#allocation27_spill] sm:$0xff] %v5687_v23  ;;  %v4686_v19 = vpack.i.bf16 %v5629_v5, %v5687_v23  ;;  %v1672_v1 = vadd.f32 %v4191_v59, %v1543_v45  ;;  %v2333_v16 = vadd.f32 %v4277_v11, %v2204_v2  ;;  %v4305_v26 = vsel %vm2495_vm13, 1.0, %v6516_v35 }
 0x100   :  { %v2590_v7 = vadd.f32 %v4304_v13, %v2461_v30  ;;  %v4317_v13 = vsel %vm2624_vm15, 1.0, %v6516_v35  ;;  %v4327_v34 = vsel %vm2753_vm2, 1.0, %v6516_v35  ;;  %vm1319_vm4 = vcmp.eq.s32.totalorder %v5002_v48, %v4774_v4 }
 0x101   :  { %4687 = vxpose.xlu1.b32.cont [7/16] (narrow) %v4686_v19, 16  ;;  %v1801_v24 = vadd.f32 %v4205_v46, %v1672_v1  ;;  %v5739_v19 = vadd.s32 192, %v4774_v4  ;;  %v4164_v30 = vsel %vm1319_vm4, 1.0, %v6516_v35  ;;  %vm1448_vm6 = vcmp.eq.s32.totalorder %v5002_v48, %v5314_v44 }
 0x102   :  { %v2719_v47 = vadd.f32 %v4316_v31, %v2590_v7  ;;  %v4178_v43 = vsel %vm1448_vm6, 1.0, %v6516_v35  ;;  %vm1577_vm7 = vcmp.eq.s32.totalorder %v5002_v48, %v5317_v50  ;;  %vm1706_vm8 = vcmp.eq.s32.totalorder %v5002_v48, %v5326_v52 }
 0x103   :  { %v5735_v31 = vadd.f32 %v4219_v28, %v1801_v24  ;;  %vm2882_vm1 = vcmp.eq.s32.totalorder %v4957_v39, %v5739_v19  ;;  %v1544_v46 = vadd.f32 %v4178_v43, %v4164_v30  ;;  %v4192_v7 = vsel %vm1577_vm7, 1.0, %v6516_v35 }
 0x104   :  { %v5731_v15 = vadd.f32 %v4326_v53, %v2719_v47  ;;  %v2462_v53 = vadd.f32 %v4291_v37, %v2333_v16  ;;  %v4335_v45 = vsel %vm2882_vm1, 1.0, %v6516_v35  ;;  %v4206_v28 = vsel %vm1706_vm8, 1.0, %v6516_v35 }
 0x105   :  { %6532 = vst [vmem:[#allocation29_spill] sm:$0xff] %v5735_v31  ;;  %vm1835_vm9 = vcmp.eq.s32.totalorder %v5002_v48, %v5337_v62  ;;  %vm1980_vm10 = vcmp.eq.s32.totalorder %v4962_v40, %v5345_v36  ;;  %vm2109_vm11 = vcmp.eq.s32.totalorder %v4962_v40, %v5360_v55  ;;  %v1673_v38 = vadd.f32 %v4192_v7, %v1544_v46 }
 0x106   :  { %6531 = vst [vmem:[#allocation28_spill] sm:$0xff] %v5731_v15  ;;  %v4688_v29 = vpack.i.bf16 %v5678_v17, %v5731_v15  ;;  %v2591_v59 = vadd.f32 %v4305_v26, %v2462_v53  ;;  %v4220_v1 = vsel %vm1835_vm9, 1.0, %v6516_v35  ;;  %v4250_v8 = vsel %vm1980_vm10, 1.0, %v6516_v35 }
 0x107   :  { %v4264_v47 = vsel %vm2109_vm11, 1.0, %v6516_v35  ;;  %vm2238_vm12 = vcmp.eq.s32.totalorder %v4962_v40, %v5369_v25  ;;  %vm2367_vm14 = vcmp.eq.s32.totalorder %v4962_v40, %v5382_v22  ;;  %vm2496_vm13 = vcmp.eq.s32.totalorder %v4962_v40, %v5432_v56 }
 0x108   :  { %4689 = vxpose.xlu1.b32.cont [8/16] (narrow) %v4688_v29, 16  ;;  %v2720_v39 = vadd.f32 %v4317_v13, %v2591_v59  ;;  %v1802_v2 = vadd.f32 %v4206_v28, %v1673_v38  ;;  %v2205_v11 = vadd.f32 %v4264_v47, %v4250_v8  ;;  %v4278_v37 = vsel %vm2238_vm12, 1.0, %v6516_v35 }
 0x109   :  { %v4292_v24 = vsel %vm2367_vm14, 1.0, %v6516_v35  ;;  %vm2625_vm15 = vcmp.eq.s32.totalorder %v4962_v40, %v5549_v14  ;;  %vm2754_vm2 = vcmp.eq.s32.totalorder %v4962_v40, %v5643_v32  ;;  %v4306_v29 = vsel %vm2496_vm13, 1.0, %v6516_v35 }
 0x10a   :  { %v2849_v48 = vadd.f32 %v4327_v34, %v2720_v39  ;;  %v5781_v26 = vadd.f32 %v4220_v1, %v1802_v2  ;;  %v2334_v13 = vadd.f32 %v4278_v37, %v2205_v11  ;;  %v4318_v34 = vsel %vm2625_vm15, 1.0, %v6516_v35 }
 0x10b   :  { %vm2883_vm4 = vcmp.eq.s32.totalorder %v4962_v40, %v5739_v19  ;;  %vm1320_vm6 = vcmp.eq.s32.totalorder %v5047_v57, %v4774_v4  ;;  %vm1449_vm1 = vcmp.eq.s32.totalorder %v5047_v57, %v5314_v44  ;;  %v4328_v43 = vsel %vm2754_vm2, 1.0, %v6516_v35 }
 0x10c   :  { %v5779_v16 = vadd.f32 %v4335_v45, %v2849_v48  ;;  %6534 = vst [vmem:[#allocation31_spill] sm:$0xff] %v5781_v26  ;;  %v2463_v30 = vadd.f32 %v4292_v24, %v2334_v13  ;;  %v4165_v45 = vsel %vm1320_vm6, 1.0, %v6516_v35  ;;  %v4179_v46 = vsel %vm1449_vm1, 1.0, %v6516_v35 }
 0x10d   :  { %vm1578_vm7 = vcmp.eq.s32.totalorder %v5047_v57, %v5317_v50  ;;  %vm1707_vm8 = vcmp.eq.s32.totalorder %v5047_v57, %v5326_v52  ;;  %v4336_v7 = vsel %vm2883_vm4, 1.0, %v6516_v35  ;;  %v1545_v28 = vadd.f32 %v4179_v46, %v4165_v45 }
 0x10e   :  { %6533 = vst [vmem:[#allocation30_spill] sm:$0xff] %v5779_v16  ;;  %v4690_v53 = vpack.i.bf16 %v5735_v31, %v5779_v16  ;;  %v2592_v40 = vadd.f32 %v4306_v29, %v2463_v30  ;;  %v4193_v39 = vsel %vm1578_vm7, 1.0, %v6516_v35  ;;  %v4207_v38 = vsel %vm1707_vm8, 1.0, %v6516_v35 }
 0x10f   :  { %vm1836_vm9 = vcmp.eq.s32.totalorder %v5047_v57, %v5337_v62  ;;  %vm2110_vm10 = vcmp.eq.s32.totalorder %v5005_v49, %v5360_v55  ;;  %vm2239_vm11 = vcmp.eq.s32.totalorder %v5005_v49, %v5369_v25  ;;  %v1674_v8 = vadd.f32 %v4193_v39, %v1545_v28 }
 0x110   :  { %4691 = vxpose.xlu1.b32.cont [9/16] (narrow) %v4690_v53, 16  ;;  %v2721_v1 = vadd.f32 %v4318_v34, %v2592_v40  ;;  %v4221_v47 = vsel %vm1836_vm9, 1.0, %v6516_v35  ;;  %vm1965_vm12 = vcmp.eq.s32.totalorder %v5047_v57, %v5345_v36  ;;  %v4265_v48 = vsel %vm2110_vm10, 1.0, %v6516_v35 }
 0x111   :  { %v4279_v2 = vsel %vm2239_vm11, 1.0, %v6516_v35  ;;  %vm2368_vm14 = vcmp.eq.s32.totalorder %v5005_v49, %v5382_v22  ;;  %vm2497_vm13 = vcmp.eq.s32.totalorder %v5005_v49, %v5432_v56  ;;  %v1803_v37 = vadd.f32 %v4207_v38, %v1674_v8 }
 0x112   :  { %v2850_v11 = vadd.f32 %v4328_v43, %v2721_v1  ;;  %v2335_v24 = vadd.f32 %v4279_v2, %v4265_v48  ;;  %v4293_v13 = vsel %vm2368_vm14, 1.0, %v6516_v35  ;;  %v4307_v29 = vsel %vm2497_vm13, 1.0, %v6516_v35 }
 0x113   :  { %vm2626_vm15 = vcmp.eq.s32.totalorder %v5005_v49, %v5549_v14  ;;  %vm2755_vm2 = vcmp.eq.s32.totalorder %v5005_v49, %v5643_v32  ;;  %vm2884_vm4 = vcmp.eq.s32.totalorder %v5005_v49, %v5739_v19  ;;  %v1932_v34 = vadd.f32 %v4221_v47, %v1803_v37 }
 0x114   :  { %v5828_v57 = vadd.f32 %v4336_v7, %v2850_v11  ;;  %v4235_v53 = vsel %vm1965_vm12, 1.0, %v6516_v35  ;;  %v2464_v30 = vadd.f32 %v4293_v13, %v2335_v24  ;;  %v4319_v45 = vsel %vm2626_vm15, 1.0, %v6516_v35 }
 0x115   :  { %v4329_v46 = vsel %vm2755_vm2, 1.0, %v6516_v35  ;;  %v5836_v40 = vadd.s32 208, %v4774_v4  ;;  %vm1321_vm6 = vcmp.eq.s32.totalorder %v5050_v58, %v4774_v4  ;;  %v4337_v38 = vsel %vm2884_vm4, 1.0, %v6516_v35 }
 0x116   :  { %6535 = vst [vmem:[#allocation32_spill] sm:$0xff] %v5828_v57  ;;  %v4692_v7 = vpack.i.bf16 %v5781_v26, %v5828_v57  ;;  %v2593_v39 = vadd.f32 %v4307_v29, %v2464_v30  ;;  %v4166_v1 = vsel %vm1321_vm6, 1.0, %v6516_v35  ;;  %vm1450_vm7 = vcmp.eq.s32.totalorder %v5050_v58, %v5314_v44 }
 0x117   :  { %vm3013_vm1 = vcmp.eq.s32.totalorder %v5005_v49, %v5836_v40  ;;  %vm1579_vm8 = vcmp.eq.s32.totalorder %v5050_v58, %v5317_v50  ;;  %vm1708_vm9 = vcmp.eq.s32.totalorder %v5050_v58, %v5326_v52  ;;  %v5854_v8 = vadd.f32 %v4235_v53, %v1932_v34  ;;  %v6537_v53 = vld [vmem:[#allocation8_spill] sm:$0xff] }
 0x118   :  { %4693 = vxpose.xlu1.b32.cont [10/16] (narrow) %v4692_v7, 16  ;;  %v2722_v47 = vadd.f32 %v4319_v45, %v2593_v39  ;;  %v4180_v48 = vsel %vm1450_vm7, 1.0, %v6516_v35  ;;  %v4194_v2 = vsel %vm1579_vm8, 1.0, %v6516_v35  ;;  %v4343_v49 = vsel %vm3013_vm1, 1.0, %v6516_v35 }
 0x119   :  { %6536 = vst [vmem:[#allocation33_spill] sm:$0xff] %v5854_v8  ;;  %v1546_v37 = vadd.f32 %v4180_v48, %v4166_v1  ;;  %v4208_v24 = vsel %vm1708_vm9, 1.0, %v6516_v35  ;;  %vm1837_vm10 = vcmp.eq.s32.totalorder %v5050_v58, %v5337_v62  ;;  %vm1966_vm11 = vcmp.eq.s32.totalorder %v5050_v58, %v5345_v36 }
 0x11a   :  { %v2851_v29 = vadd.f32 %v4329_v46, %v2722_v47  ;;  %v4222_v34 = vsel %vm1837_vm10, 1.0, %v6516_v35  ;;  %vm2111_vm12 = vcmp.eq.s32.totalorder %v6537_v53, %v5360_v55  ;;  %vm2240_vm14 = vcmp.eq.s32.totalorder %v6537_v53, %v5369_v25 }
 0x11b   :  { %v1675_v30 = vadd.f32 %v4194_v2, %v1546_v37  ;;  %v4266_v45 = vsel %vm2111_vm12, 1.0, %v6516_v35  ;;  %vm2369_vm13 = vcmp.eq.s32.totalorder %v6537_v53, %v5382_v22  ;;  %v4280_v46 = vsel %vm2240_vm14, 1.0, %v6516_v35 }
 0x11c   :  { %v2980_v7 = vadd.f32 %v4337_v38, %v2851_v29  ;;  %v4294_v39 = vsel %vm2369_vm13, 1.0, %v6516_v35  ;;  %vm2498_vm15 = vcmp.eq.s32.totalorder %v6537_v53, %v5432_v56  ;;  %v4236_v47 = vsel %vm1966_vm11, 1.0, %v6516_v35 }
 0x11d   :  { %v1804_v1 = vadd.f32 %v4208_v24, %v1675_v30  ;;  %v2336_v48 = vadd.f32 %v4280_v46, %v4266_v45  ;;  %vm2627_vm2 = vcmp.eq.s32.totalorder %v6537_v53, %v5549_v14  ;;  %v4308_v38 = vsel %vm2498_vm15, 1.0, %v6516_v35 }
 0x11e   :  { %v5887_v37 = vadd.f32 %v4343_v49, %v2980_v7  ;;  %vm2756_vm4 = vcmp.eq.s32.totalorder %v6537_v53, %v5643_v32  ;;  %vm2885_vm6 = vcmp.eq.s32.totalorder %v6537_v53, %v5739_v19  ;;  %v4320_v30 = vsel %vm2627_vm2, 1.0, %v6516_v35  ;;  %v6538_v7 = vld [vmem:[#allocation11_spill] sm:$0xff] }
 0x11f   :  { %v1933_v29 = vadd.f32 %v4222_v34, %v1804_v1  ;;  %v2465_v24 = vadd.f32 %v4294_v39, %v2336_v48  ;;  %v4330_v45 = vsel %vm2756_vm4, 1.0, %v6516_v35  ;;  %v4338_v49 = vsel %vm2885_vm6, 1.0, %v6516_v35 }
 0x120   :  { %v4694_v46 = vpack.i.bf16 %v5854_v8, %v5887_v37  ;;  %vm1322_vm1 = vcmp.eq.s32.totalorder %v6538_v7, %v4774_v4  ;;  %vm1451_vm7 = vcmp.eq.s32.totalorder %v6538_v7, %v5314_v44  ;;  %vm3014_vm8 = vcmp.eq.s32.totalorder %v6537_v53, %v5836_v40 }
 0x121   :  { %v5905_v61 = vadd.f32 %v4236_v47, %v1933_v29  ;;  %v2594_v34 = vadd.f32 %v4308_v38, %v2465_v24  ;;  %v4167_v39 = vsel %vm1322_vm1, 1.0, %v6516_v35  ;;  %v4181_v48 = vsel %vm1451_vm7, 1.0, %v6516_v35 }
 0x122   :  { %v5831_v43 = vpop.f32.mrb[0].mxu1  ;;  %4695 = vxpose.xlu1.b32.cont [11/16] (narrow) %v4694_v46, 16  ;;  %vm1580_vm9 = vcmp.eq.s32.totalorder %v6538_v7, %v5317_v50  ;;  %vm1709_vm10 = vcmp.eq.s32.totalorder %v6538_v7, %v5326_v52  ;;  %vm1838_vm11 = vcmp.eq.s32.totalorder %v6538_v7, %v5337_v62  ;;  %v1547_v38 = vadd.f32 %v4181_v48, %v4167_v39  ;;  %v6540_v39 = vld [vmem:[#allocation9_spill] sm:$0xff] }
 0x123   :  { %v5840_v28 = vpop.f32.mrb[1].mxu1  ;;  %6539 = vst [vmem:[#allocation8_spill] sm:$0xff] %v5905_v61  ;;  %v2723_v47 = vadd.f32 %v4320_v30, %v2594_v34  ;;  %v4195_v29 = vsel %vm1580_vm9, 1.0, %v6516_v35  ;;  %v4344_v24 = vsel %vm3014_vm8, 1.0, %v6516_v35  ;;  %v4209_v46 = vsel %vm1709_vm10, 1.0, %v6516_v35 }
 0x124   :  { %v4223_v41 = vsel %vm1838_vm11, 1.0, %v6516_v35  ;;  %vm1967_vm12 = vcmp.eq.s32.totalorder %v6538_v7, %v5345_v36  ;;  %v1676_v51 = vadd.f32 %v4195_v29, %v1547_v38  ;;  %vm2096_vm14 = vcmp.eq.s32.totalorder %v6538_v7, %v5360_v55 }
 0x125   :  { %v2852_v3 = vadd.f32 %v4330_v45, %v2723_v47  ;;  %v4237_v30 = vsel %vm1967_vm12, 1.0, %v6516_v35  ;;  %vm2241_vm13 = vcmp.eq.s32.totalorder %v6540_v39, %v5369_v25  ;;  %vm2370_vm15 = vcmp.eq.s32.totalorder %v6540_v39, %v5382_v22 }
 0x126   :  { %v5858_v11 = vpop.f32.mrb[2].mxu1  ;;  %vm2499_vm2 = vcmp.eq.s32.totalorder %v6540_v39, %v5432_v56  ;;  %vm2628_vm4 = vcmp.eq.s32.totalorder %v6540_v39, %v5549_v14  ;;  %v1805_v48 = vadd.f32 %v4209_v46, %v1676_v51  ;;  %v4281_v47 = vsel %vm2241_vm13, 1.0, %v6516_v35 }
 0x127   :  { %v5864_v13 = vpop.f32.mrb[3].mxu1  ;;  %v2981_v45 = vadd.f32 %v4338_v49, %v2852_v3  ;;  %v4295_v7 = vsel %vm2370_vm15, 1.0, %v6516_v35  ;;  %v4251_v38 = vsel %vm2096_vm14, 1.0, %v6516_v35  ;;  %v4309_v53 = vsel %vm2499_vm2, 1.0, %v6516_v35 }
 0x128   :  { %v2466_v29 = vadd.f32 %v4295_v7, %v4281_v47  ;;  %vm2757_vm6 = vcmp.eq.s32.totalorder %v6540_v39, %v5643_v32  ;;  %v1934_v31 = vadd.f32 %v4223_v41, %v1805_v48  ;;  %v4321_v3 = vsel %vm2628_vm4, 1.0, %v6516_v35  ;;  %v6541_v48 = vld [vmem:[#allocation12_spill] sm:$0xff] }
 0x129   :  { %v5950_v8 = vadd.f32 %v4344_v24, %v2981_v45  ;;  %vm2886_vm1 = vcmp.eq.s32.totalorder %v6540_v39, %v5739_v19  ;;  %v4331_v46 = vsel %vm2757_vm6, 1.0, %v6516_v35  ;;  %vm3015_vm7 = vcmp.eq.s32.totalorder %v6540_v39, %v5836_v40 }
 0x12a   :  { %v5880_v58 = vpop.f32.mrb[4].mxu1  ;;  %v2595_v49 = vadd.f32 %v4309_v53, %v2466_v29  ;;  %v5961_v47 = vadd.s32 224, %v4774_v4  ;;  %v2063_v41 = vadd.f32 %v4237_v30, %v1934_v31  ;;  %v4339_v45 = vsel %vm2886_vm1, 1.0, %v6516_v35 }
 0x12b   :  { %v5885_v2 = vpop.f32.mrb[5].mxu1  ;;  %v4696_v24 = vpack.i.bf16 %v5905_v61, %v5950_v8  ;;  %vm1323_vm8 = vcmp.eq.s32.totalorder %v6541_v48, %v4774_v4  ;;  %vm1452_vm10 = vcmp.eq.s32.totalorder %v6541_v48, %v5314_v44  ;;  %v4345_v31 = vsel %vm3015_vm7, 1.0, %v6516_v35 }
 0x12c   :  { %v2724_v7 = vadd.f32 %v4321_v3, %v2595_v49  ;;  %vm3144_vm9 = vcmp.eq.s32.totalorder %v6540_v39, %v5961_v47  ;;  %v4168_v53 = vsel %vm1323_vm8, 1.0, %v6516_v35  ;;  %v5975_v26 = vadd.f32 %v4251_v38, %v2063_v41 }
 0x12d   :  { %4697 = vxpose.xlu1.b32.cont [12/16] (narrow) %v4696_v24, 16  ;;  %v4182_v30 = vsel %vm1452_vm10, 1.0, %v6516_v35  ;;  %vm1581_vm11 = vcmp.eq.s32.totalorder %v6541_v48, %v5317_v50  ;;  %vm1710_vm12 = vcmp.eq.s32.totalorder %v6541_v48, %v5326_v52  ;;  %v4349_v24 = vsel %vm3144_vm9, 1.0, %v6516_v35 }
 0x12e   :  { %v5903_v59 = vpop.f32.mrb[6].mxu1  ;;  %6542 = vst [vmem:[#allocation11_spill] sm:$0xff] %v5975_v26  ;;  %v2853_v39 = vadd.f32 %v4331_v46, %v2724_v7  ;;  %v1548_v49 = vadd.f32 %v4182_v30, %v4168_v53  ;;  %v4196_v61 = vsel %vm1581_vm11, 1.0, %v6516_v35  ;;  %v4210_v38 = vsel %vm1710_vm12, 1.0, %v6516_v35  ;;  %v6543_v30 = vld [vmem:[#allocation10_spill] sm:$0xff] }
 0x12f   :  { %v5910_v1 = vpop.f32.mrb[7].mxu1  ;;  %vm1839_vm14 = vcmp.eq.s32.totalorder %v6541_v48, %v5337_v62  ;;  %vm1968_vm13 = vcmp.eq.s32.totalorder %v6541_v48, %v5345_v36  ;;  %vm2097_vm15 = vcmp.eq.s32.totalorder %v6541_v48, %v5360_v55  ;;  %vm2242_vm2 = vcmp.eq.s32.totalorder %v6543_v30, %v5369_v25 }
 0x130   :  { %v2982_v41 = vadd.f32 %v4339_v45, %v2853_v39  ;;  %v1677_v5 = vadd.f32 %v4196_v61, %v1548_v49  ;;  %v4224_v46 = vsel %vm1839_vm14, 1.0, %v6516_v35  ;;  %v4238_v53 = vsel %vm1968_vm13, 1.0, %v6516_v35 }
 0x131   :  { %vm2371_vm4 = vcmp.eq.s32.totalorder %v6543_v30, %v5382_v22  ;;  %vm2500_vm6 = vcmp.eq.s32.totalorder %v6543_v30, %v5432_v56  ;;  %v4282_v49 = vsel %vm2242_vm2, 1.0, %v6516_v35  ;;  %vm2629_vm1 = vcmp.eq.s32.totalorder %v6543_v30, %v5549_v14 }
 0x132   :  { %v5927_v21 = vpop.f32.mrb[8].mxu1  ;;  %v3111_v61 = vadd.f32 %v4345_v31, %v2982_v41  ;;  %v1806_v39 = vadd.f32 %v4210_v38, %v1677_v5  ;;  %v4296_v17 = vsel %vm2371_vm4, 1.0, %v6516_v35  ;;  %v4310_v16 = vsel %vm2500_vm6, 1.0, %v6516_v35 }
 0x133   :  { %v5932_v34 = vpop.f32.mrb[9].mxu1  ;;  %v2467_v57 = vadd.f32 %v4296_v17, %v4282_v49  ;;  %vm2758_vm7 = vcmp.eq.s32.totalorder %v6543_v30, %v5643_v32  ;;  %v4252_v5 = vsel %vm2097_vm15, 1.0, %v6516_v35  ;;  %v4322_v31 = vsel %vm2629_vm1, 1.0, %v6516_v35 }
 0x134   :  { %v6013_v27 = vadd.f32 %v4349_v24, %v3111_v61  ;;  %v1935_v12 = vadd.f32 %v4224_v46, %v1806_v39  ;;  %v4332_v41 = vsel %vm2758_vm7, 1.0, %v6516_v35  ;;  %vm2887_vm8 = vcmp.eq.s32.totalorder %v6543_v30, %v5739_v19  ;;  %v6544_v39 = vld [vmem:[#allocation15_spill] sm:$0xff] }
 0x135   :  { %v2596_v17 = vadd.f32 %v4310_v16, %v2467_v57  ;;  %vm3016_vm9 = vcmp.eq.s32.totalorder %v6543_v30, %v5836_v40  ;;  %v4340_v61 = vsel %vm2887_vm8, 1.0, %v6516_v35  ;;  %vm3145_vm10 = vcmp.eq.s32.totalorder %v6543_v30, %v5961_v47 }
 0x136   :  { %v5948_v9 = vpop.f32.mrb[10].mxu1  ;;  %v4698_v46 = vpack.i.bf16 %v5975_v26, %v6013_v27  ;;  %v2064_v48 = vadd.f32 %v4238_v53, %v1935_v12  ;;  %v4346_v57 = vsel %vm3016_vm9, 1.0, %v6516_v35  ;;  %vm1324_vm11 = vcmp.eq.s32.totalorder %v6544_v39, %v4774_v4 }
 0x137   :  { %v5955_v51 = vpop.f32.mrb[11].mxu1  ;;  %v2725_v16 = vadd.f32 %v4322_v31, %v2596_v17  ;;  %vm1453_vm12 = vcmp.eq.s32.totalorder %v6544_v39, %v5314_v44  ;;  %v4169_v15 = vsel %vm1324_vm11, 1.0, %v6516_v35  ;;  %vm1582_vm14 = vcmp.eq.s32.totalorder %v6544_v39, %v5317_v50 }
 0x138   :  { %4699 = vxpose.xlu1.b32.cont [13/16] (narrow) %v4698_v46, 16  ;;  %v6039_v49 = vadd.f32 %v4252_v5, %v2064_v48  ;;  %v4183_v12 = vsel %vm1453_vm12, 1.0, %v6516_v35  ;;  %v4197_v23 = vsel %vm1582_vm14, 1.0, %v6516_v35  ;;  %vm1711_vm13 = vcmp.eq.s32.totalorder %v6544_v39, %v5326_v52  ;;  %v6546_v5 = vld [vmem:[#allocation13_spill] sm:$0xff] }
 0x139   :  { %v2854_v31 = vadd.f32 %v4332_v41, %v2725_v16  ;;  %v1549_v17 = vadd.f32 %v4183_v12, %v4169_v15  ;;  %v4211_v46 = vsel %vm1711_vm13, 1.0, %v6516_v35  ;;  %vm1840_vm15 = vcmp.eq.s32.totalorder %v6544_v39, %v5337_v62 }
 0x13a   :  { %v5973_v29 = vpop.f32.mrb[12].mxu1  ;;  %6545 = vst [vmem:[#allocation9_spill] sm:$0xff] %v6039_v49  ;;  %vm1969_vm2 = vcmp.eq.s32.totalorder %v6544_v39, %v5345_v36  ;;  %v4350_v15 = vsel %vm3145_vm10, 1.0, %v6516_v35  ;;  %v4225_v16 = vsel %vm1840_vm15, 1.0, %v6516_v35  ;;  %vm2098_vm4 = vcmp.eq.s32.totalorder %v6544_v39, %v5360_v55 }
 0x13b   :  { %v5981_v3 = vpop.f32.mrb[13].mxu1  ;;  %v2983_v41 = vadd.f32 %v4340_v61, %v2854_v31  ;;  %v1678_v48 = vadd.f32 %v4197_v23, %v1549_v17  ;;  %v4239_v12 = vsel %vm1969_vm2, 1.0, %v6516_v35  ;;  %vm2372_vm6 = vcmp.eq.s32.totalorder %v6546_v5, %v5382_v22 }
 0x13c   :  { %vm2501_vm1 = vcmp.eq.s32.totalorder %v6546_v5, %v5432_v56  ;;  %v4253_v30 = vsel %vm2098_vm4, 1.0, %v6516_v35  ;;  %vm2227_vm7 = vcmp.eq.s32.totalorder %v6544_v39, %v5369_v25  ;;  %v4297_v17 = vsel %vm2372_vm6, 1.0, %v6516_v35 }
 0x13d   :  { %v3112_v31 = vadd.f32 %v4346_v57, %v2983_v41  ;;  %v1807_v26 = vadd.f32 %v4211_v46, %v1678_v48  ;;  %v4311_v54 = vsel %vm2501_vm1, 1.0, %v6516_v35  ;;  %vm2630_vm8 = vcmp.eq.s32.totalorder %v6546_v5, %v5549_v14 }
 0x13e   :  { %v5995_v7 = vpop.f32.mrb[14].mxu1  ;;  %vm2759_vm9 = vcmp.eq.s32.totalorder %v6546_v5, %v5643_v32  ;;  %v2597_v46 = vadd.f32 %v4311_v54, %v4297_v17  ;;  %v4323_v41 = vsel %vm2630_vm8, 1.0, %v6516_v35  ;;  %v4267_v39 = vsel %vm2227_vm7, 1.0, %v6516_v35 }
 0x13f   :  { %v6004_v45 = vpop.f32.mrb[15].mxu1  ;;  %v6084_v33 = vadd.f32 %v4350_v15, %v3112_v31  ;;  %v1936_v57 = vadd.f32 %v4225_v16, %v1807_v26  ;;  %v4333_v48 = vsel %vm2759_vm9, 1.0, %v6516_v35  ;;  %vm2888_vm10 = vcmp.eq.s32.totalorder %v6546_v5, %v5739_v19 }
 0x140   :  { %vm3017_vm11 = vcmp.eq.s32.totalorder %v6546_v5, %v5836_v40  ;;  %v2726_v26 = vadd.f32 %v4323_v41, %v2597_v46  ;;  %vm3146_vm12 = vcmp.eq.s32.totalorder %v6546_v5, %v5961_v47  ;;  %v4341_v16 = vsel %vm2888_vm10, 1.0, %v6516_v35 }
 0x141   :  { %v4700_v15 = vpack.i.bf16 %v6039_v49, %v6084_v33  ;;  %v2065_v31 = vadd.f32 %v4239_v12, %v1936_v57  ;;  %v4347_v17 = vsel %vm3017_vm11, 1.0, %v6516_v35  ;;  %v6104_v10 = vadd.s32 240, %v4774_v4 }
 0x142   :  { %v6020_v38 = vpop.f32.mrb[16].mxu1  ;;  %vm1325_vm14 = vcmp.eq.s32.totalorder %v5140_v60, %v4774_v4  ;;  %v2855_v49 = vadd.f32 %v4333_v48, %v2726_v26  ;;  %vm1454_vm13 = vcmp.eq.s32.totalorder %v5140_v60, %v5314_v44  ;;  %vm1583_vm2 = vcmp.eq.s32.totalorder %v5140_v60, %v5317_v50 }
 0x143   :  { %v6027_v24 = vpop.f32.mrb[17].mxu1  ;;  %4701 = vxpose.xlu1.b32.cont [14/16] (narrow) %v4700_v15, 16  ;;  %v2194_v63 = vadd.f32 %v4253_v30, %v2065_v31  ;;  %v4170_v12 = vsel %vm1325_vm14, 1.0, %v6516_v35  ;;  %vm3275_vm15 = vcmp.eq.s32.totalorder %v6546_v5, %v6104_v10  ;;  %v4184_v57 = vsel %vm1454_vm13, 1.0, %v6516_v35 }
 0x144   :  { %vm1712_vm4 = vcmp.eq.s32.totalorder %v5140_v60, %v5326_v52  ;;  %v2984_v41 = vadd.f32 %v4341_v16, %v2855_v49  ;;  %v4351_v44 = vsel %vm3146_vm12, 1.0, %v6516_v35  ;;  %v1550_v48 = vadd.f32 %v4184_v57, %v4170_v12  ;;  %v6547_v16 = vld [vmem:[#allocation14_spill] sm:$0xff] }
 0x145   :  { %v6120_v30 = vadd.f32 %v4267_v39, %v2194_v63  ;;  %v4198_v31 = vsel %vm1583_vm2, 1.0, %v6516_v35  ;;  %v4212_v50 = vsel %vm1712_vm4, 1.0, %v6516_v35  ;;  %vm1841_vm6 = vcmp.eq.s32.totalorder %v5140_v60, %v5337_v62 }
 0x146   :  { %v6045_v53 = vpop.f32.mrb[18].mxu1  ;;  %vm1970_vm1 = vcmp.eq.s32.totalorder %v5140_v60, %v5345_v36  ;;  %v3113_v52 = vadd.f32 %v4347_v17, %v2984_v41  ;;  %v4353_v63 = vsel %vm3275_vm15, 1.0, %v6516_v35  ;;  %v1679_v49 = vadd.f32 %v4198_v31, %v1550_v48 }
 0x147   :  { %v6050_v18 = vpop.f32.mrb[19].mxu1  ;;  %v4226_v5 = vsel %vm1841_vm6, 1.0, %v6516_v35  ;;  %v4240_v26 = vsel %vm1970_vm1, 1.0, %v6516_v35  ;;  %vm2099_vm7 = vcmp.eq.s32.totalorder %v5140_v60, %v5360_v55  ;;  %vm2373_vm8 = vcmp.eq.s32.totalorder %v6547_v16, %v5382_v22 }
 0x148   :  { %vm2502_vm9 = vcmp.eq.s32.totalorder %v6547_v16, %v5432_v56  ;;  %v3242_v12 = vadd.f32 %v4351_v44, %v3113_v52  ;;  %v1808_v57 = vadd.f32 %v4212_v50, %v1679_v49  ;;  %vm2228_vm10 = vcmp.eq.s32.totalorder %v5140_v60, %v5369_v25 }
 0x149   :  { %v4254_v55 = vsel %vm2099_vm7, 1.0, %v6516_v35  ;;  %v4298_v22 = vsel %vm2373_vm8, 1.0, %v6516_v35  ;;  %v4312_v56 = vsel %vm2502_vm9, 1.0, %v6516_v35  ;;  %vm2631_vm11 = vcmp.eq.s32.totalorder %v6547_v16, %v5549_v14 }
 0x14a   :  { %v6071_v61 = vpop.f32.mrb[20].mxu1  ;;  %v6154_v31 = vadd.f32 %v4353_v63, %v3242_v12  ;;  %v4324_v50 = vsel %vm2631_vm11, 1.0, %v6516_v35  ;;  %vm2760_vm12 = vcmp.eq.s32.totalorder %v6547_v16, %v5643_v32  ;;  %vm2889_vm14 = vcmp.eq.s32.totalorder %v6547_v16, %v5739_v19 }
 0x14b   :  { %v6076_v23 = vpop.f32.mrb[21].mxu1  ;;  %vm3018_vm13 = vcmp.eq.s32.totalorder %v6547_v16, %v5836_v40  ;;  %v4268_v32 = vsel %vm2228_vm10, 1.0, %v6516_v35  ;;  %v4334_v19 = vsel %vm2760_vm12, 1.0, %v6516_v35  ;;  %vm3147_vm15 = vcmp.eq.s32.totalorder %v6547_v16, %v5961_v47 }
 0x14c   :  { %v4702_v14 = vpack.i.bf16 %v6120_v30, %v6154_v31  ;;  %vm3276_vm2 = vcmp.eq.s32.totalorder %v6547_v16, %v6104_v10  ;;  %vm3670_vm4 = vcmp.lt.s32.totalorder %v4774_v4, 4  ;;  %vm3673_vm6 = vcmp.ge.s32.totalorder %v4774_v4, 4 }
 0x14d   :  { %vm3674_vm1 = vcmp.lt.s32.totalorder %v4774_v4, 8  ;;  %vm4746_vm11 = vmmov 0  }
 0x14e   :  { %v6093_v42 = vpop.f32.mrb[22].mxu1  ;;  %4703 = vxpose.xlu1.b32.cont [15/16] (narrow) %v4702_v14, 16  ;;  %vm3675_vm7 = vmand %vm3673_vm6, %vm3674_vm1 }
 0x14f   :  { %v6099_v54 = vpop.f32.mrb[23].mxu1 }
 0x152   :  { %v6118_v46 = vpop.f32.mrb[24].mxu1 }
 0x153   :  { %v6126_v15 = vpop.f32.mrb[25].mxu1 }
 0x156   :  { %v373_v39 = vpop.f32.mrb[0].mxu0  ;;  %v6144_v17 = vpop.f32.mrb[26].mxu1 }
 0x157   :  { %v3373_v62 = vmul.f32 %v5831_v43, %v373_v39  ;;  %v375_v36 = vpop.f32.mrb[1].mxu0  ;;  %v6149_v48 = vpop.f32.mrb[27].mxu1  ;;  %v1937_v43 = vadd.f32 %v4226_v5, %v1808_v57  ;;  %v2598_v39 = vadd.f32 %v4312_v56, %v4298_v22 }
 0x158   :  { %v3374_v41 = vmul.f32 %v5840_v28, %v375_v36 }
 0x159   :  { %v2066_v49 = vadd.f32 %v4240_v26, %v1937_v43  ;;  %v2727_v5 = vadd.f32 %v4324_v50, %v2598_v39  ;;  %v4348_v43 = vsel %vm3018_vm13, 1.0, %v6516_v35 }
 0x15a   :  { %v379_v44 = vpop.f32.mrb[2].mxu0  ;;  %v6166_v63 = vpop.f32.mrb[28].mxu1 }
 0x15b   :  { %v3375_v28 = vmul.f32 %v5858_v11, %v379_v44  ;;  %v381_v52 = vpop.f32.mrb[3].mxu0  ;;  %v6171_v12 = vpop.f32.mrb[29].mxu1  ;;  %v4342_v11 = vsel %vm2889_vm14, 1.0, %v6516_v35  ;;  %v2195_v22 = vadd.f32 %v4254_v55, %v2066_v49  ;;  %v2856_v56 = vadd.f32 %v4334_v19, %v2727_v5 }
 0x15c   :  { %v3376_v36 = vmul.f32 %v5864_v13, %v381_v52  ;;  %v4352_v55 = vsel %vm3147_vm15, 1.0, %v6516_v35 }
 0x15d   :  { %v4574_v57 = vpack.c.bf16 %v3375_v28, %v3373_v62  ;;  %v6188_v44 = vadd.f32 %v4268_v32, %v2195_v22  ;;  %v2985_v62 = vadd.f32 %v4342_v11, %v2856_v56  ;;  %v4354_v28 = vsel %vm3276_vm2, 1.0, %v6516_v35 }
 0x15e   :  { %v4572_v26 = vpack.c.bf16 %v3376_v36, %v3374_v41  ;;  %v385_v13 = vpop.f32.mrb[4].mxu0  ;;  %v6186_v39 = vpop.f32.mrb[30].mxu1 }
 0x15f   :  { %v3377_v60 = vmul.f32 %v5880_v58, %v385_v13  ;;  %v387_v25 = vpop.f32.mrb[5].mxu0  ;;  %v6193_v41 = vpop.f32.mrb[31].mxu1  ;;  %v3114_v40 = vadd.f32 %v4348_v43, %v2985_v62  ;;  %v4666_v58 = vpack.c.bf16 %v6188_v44, %v6120_v30 }
 0x160   :  { %v3378_v47 = vmul.f32 %v5885_v2, %v387_v25  ;;  %4573 = vmatprep.subr.bf16.mxu0 %v4572_v26 }
 0x161   :  { %4575 = vmatpush1.bf16.msra.mxu0 %v4574_v57  ;;  %v3243_v49 = vadd.f32 %v4352_v55, %v3114_v40 }
 0x162   :  { %v391_v50 = vpop.f32.mrb[6].mxu0  ;;  %v6200_v10 = vpop.f32.mrb[32].mxu1 }
 0x163   :  { %v3379_v52 = vmul.f32 %v5903_v59, %v391_v50  ;;  %v393_v14 = vpop.f32.mrb[7].mxu0  ;;  %v6203_v16 = vpop.f32.mrb[33].mxu1  ;;  %v6205_v36 = vadd.f32 %v4354_v28, %v3243_v49 }
 0x164   :  { %v3380_v2 = vmul.f32 %v5910_v1, %v393_v14 }
 0x165   :  { %v4578_v5 = vpack.c.bf16 %v3379_v52, %v3377_v60  ;;  %v4704_v22 = vpack.i.bf16 %v6188_v44, %v6205_v36 }
 0x166   :  { %v4576_v32 = vpack.c.bf16 %v3380_v2, %v3378_v47  ;;  %v397_v19 = vpop.f32.mrb[8].mxu0  ;;  %v6210_v59 = vpop.f32.mrb[34].mxu1  ;;  %v4656_v47 = vpack.c.bf16 %v5950_v8, %v5887_v37 }
 0x167   :  { %v3381_v11 = vmul.f32 %v5927_v21, %v397_v19  ;;  %v399_v57 = vpop.f32.mrb[9].mxu0  ;;  %v6213_v26 = vpop.f32.mrb[35].mxu1  ;;  %4705 = vxpose.xlu1.b32.end [16/16] (narrow) %v4704_v22, 16 }
 0x168   :  { %v3382_v56 = vmul.f32 %v5932_v34, %v399_v57  ;;  %4577 = vmatprep.subr.bf16.mxu0 %v4576_v32 }
 0x169   :  { %4579 = vmatpush1.bf16.msra.mxu0 %v4578_v5 }
 0x16a   :  { %v403_v1 = vpop.f32.mrb[10].mxu0  ;;  %v6216_v60 = vpop.f32.mrb[36].mxu1 }
 0x16b   :  { %v3383_v13 = vmul.f32 %v5948_v9, %v403_v1  ;;  %v405_v43 = vpop.f32.mrb[11].mxu0  ;;  %v6219_v25 = vpop.f32.mrb[37].mxu1 }
 0x16c   :  { %v3384_v21 = vmul.f32 %v5955_v51, %v405_v43  ;;  %v4660_v51 = vpack.c.bf16 %v6084_v33, %v6013_v27 }
 0x16d   :  { %v4582_v62 = vpack.c.bf16 %v3383_v13, %v3381_v11 }
 0x16e   :  { %v4580_v34 = vpack.c.bf16 %v3384_v21, %v3382_v56  ;;  %v409_v55 = vpop.f32.mrb[12].mxu0  ;;  %v6224_v28 = vpop.f32.mrb[38].mxu1 }
 0x16f   :  { %v3385_v40 = vmul.f32 %v5973_v29, %v409_v55  ;;  %v411_v50 = vpop.f32.mrb[13].mxu0  ;;  %v6227_v52 = vpop.f32.mrb[39].mxu1 }
 0x170   :  { %v3386_v9 = vmul.f32 %v5981_v3, %v411_v50  ;;  %4581 = vmatprep.subr.bf16.mxu0 %v4580_v34  ;;  %v4664_v3 = vpack.c.bf16 %v6205_v36, %v6154_v31  ;;  %v6575_v31 = vld [vmem:[#allocation16_spill] sm:$0xff] }
 0x171   :  { %4583 = vmatpush1.bf16.msra.mxu0 %v4582_v62 }
 0x172   :  { %v415_v14 = vpop.f32.mrb[14].mxu0  ;;  %v6232_v5 = vpop.f32.mrb[40].mxu1 }
 0x173   :  { %v3387_v49 = vmul.f32 %v5995_v7, %v415_v14  ;;  %v417_v2 = vpop.f32.mrb[15].mxu0  ;;  %v6235_v32 = vpop.f32.mrb[41].mxu1 }
 0x174   :  { %v3388_v29 = vmul.f32 %v6004_v45, %v417_v2 }
 0x175   :  { %v4586_v19 = vpack.c.bf16 %v3387_v49, %v3385_v40 }
 0x176   :  { %v4584_v11 = vpack.c.bf16 %v3388_v29, %v3386_v9  ;;  %v421_v57 = vpop.f32.mrb[16].mxu0  ;;  %v6240_v1 = vpop.f32.mrb[42].mxu1 }
 0x177   :  { %v3389_v22 = vmul.f32 %v6020_v38, %v421_v57  ;;  %v423_v56 = vpop.f32.mrb[17].mxu0  ;;  %v6243_v13 = vpop.f32.mrb[43].mxu1 }
 0x178   :  { %v3390_v7 = vmul.f32 %v6027_v24, %v423_v56  ;;  %4585 = vmatprep.subr.bf16.mxu0 %v4584_v11 }
 0x179   :  { %4587 = vmatpush1.bf16.msra.mxu0 %v4586_v19 }
 0x17a   :  { %v427_v45 = vpop.f32.mrb[18].mxu0  ;;  %v6246_v62 = vpop.f32.mrb[44].mxu1 }
 0x17b   :  { %v3391_v43 = vmul.f32 %v6045_v53, %v427_v45  ;;  %v429_v21 = vpop.f32.mrb[19].mxu0  ;;  %v6249_v55 = vpop.f32.mrb[45].mxu1 }
 0x17c   :  { %v3392_v34 = vmul.f32 %v6050_v18, %v429_v21 }
 0x17d   :  { %v4590_v38 = vpack.c.bf16 %v3391_v43, %v3389_v22 }
 0x17e   :  { %v4588_v40 = vpack.c.bf16 %v3392_v34, %v3390_v7  ;;  %v433_v50 = vpop.f32.mrb[20].mxu0  ;;  %v6252_v14 = vpop.f32.mrb[46].mxu1 }
 0x17f   :  { %v3393_v9 = vmul.f32 %v6071_v61, %v433_v50  ;;  %v435_v24 = vpop.f32.mrb[21].mxu0  ;;  %v6255_v2 = vpop.f32.mrb[47].mxu1 }
 0x180   :  { %v3394_v49 = vmul.f32 %v6076_v23, %v435_v24  ;;  %4589 = vmatprep.subr.bf16.mxu0 %v4588_v40 }
 0x181   :  { %4591 = vmatpush1.bf16.msra.mxu0 %v4590_v38 }
 0x182   :  { %v439_v53 = vpop.f32.mrb[22].mxu0  ;;  %v6258_v19 = vpop.f32.mrb[48].mxu1 }
 0x183   :  { %v3395_v29 = vmul.f32 %v6093_v42, %v439_v53  ;;  %v441_v18 = vpop.f32.mrb[23].mxu0  ;;  %v6261_v57 = vpop.f32.mrb[49].mxu1 }
 0x184   :  { %v3396_v11 = vmul.f32 %v6099_v54, %v441_v18 }
 0x185   :  { %v4594_v61 = vpack.c.bf16 %v3395_v29, %v3393_v9 }
 0x186   :  { %v4592_v22 = vpack.c.bf16 %v3396_v11, %v3394_v49  ;;  %v445_v56 = vpop.f32.mrb[24].mxu0  ;;  %v6264_v45 = vpop.f32.mrb[50].mxu1 }
 0x187   :  { %v3397_v7 = vmul.f32 %v6118_v46, %v445_v56  ;;  %v447_v23 = vpop.f32.mrb[25].mxu0  ;;  %v6267_v21 = vpop.f32.mrb[51].mxu1 }
 0x188   :  { %v3398_v43 = vmul.f32 %v6126_v15, %v447_v23  ;;  %4593 = vmatprep.subr.bf16.mxu0 %v4592_v22 }
 0x189   :  { %4595 = vmatpush1.bf16.msra.mxu0 %v4594_v61 }
 0x18a   :  { %v451_v42 = vpop.f32.mrb[26].mxu0  ;;  %v6270_v38 = vpop.f32.mrb[52].mxu1 }
 0x18b   :  { %v3399_v34 = vmul.f32 %v6144_v17, %v451_v42  ;;  %v453_v54 = vpop.f32.mrb[27].mxu0  ;;  %v6273_v50 = vpop.f32.mrb[53].mxu1 }
 0x18c   :  { %v3400_v40 = vmul.f32 %v6149_v48, %v453_v54 }
 0x18d   :  { %v4598_v46 = vpack.c.bf16 %v3399_v34, %v3397_v7 }
 0x18e   :  { %v4596_v9 = vpack.c.bf16 %v3400_v40, %v3398_v43  ;;  %v457_v24 = vpop.f32.mrb[28].mxu0  ;;  %v6276_v53 = vpop.f32.mrb[54].mxu1 }
 0x18f   :  { %v3401_v49 = vmul.f32 %v6166_v63, %v457_v24  ;;  %v459_v15 = vpop.f32.mrb[29].mxu0  ;;  %v6279_v18 = vpop.f32.mrb[55].mxu1 }
 0x190   :  { %v3402_v29 = vmul.f32 %v6171_v12, %v459_v15  ;;  %4597 = vmatprep.subr.bf16.mxu0 %v4596_v9 }
 0x191   :  { %4599 = vmatpush1.bf16.msra.mxu0 %v4598_v46 }
 0x192   :  { %v463_v17 = vpop.f32.mrb[30].mxu0  ;;  %v6282_v61 = vpop.f32.mrb[56].mxu1 }
 0x193   :  { %v3403_v11 = vmul.f32 %v6186_v39, %v463_v17  ;;  %v465_v48 = vpop.f32.mrb[31].mxu0  ;;  %v6285_v56 = vpop.f32.mrb[57].mxu1 }
 0x194   :  { %v3404_v22 = vmul.f32 %v6193_v41, %v465_v48 }
 0x195   :  { %v4602_v63 = vpack.c.bf16 %v3403_v11, %v3401_v49 }
 0x196   :  { %v4600_v7 = vpack.c.bf16 %v3404_v22, %v3402_v29  ;;  %v469_v23 = vpop.f32.mrb[32].mxu0  ;;  %v6288_v42 = vpop.f32.mrb[58].mxu1 }
 0x197   :  { %v3405_v43 = vmul.f32 %v6200_v10, %v469_v23  ;;  %v471_v12 = vpop.f32.mrb[33].mxu0  ;;  %v6291_v54 = vpop.f32.mrb[59].mxu1 }
 0x198   :  { %v3406_v34 = vmul.f32 %v6203_v16, %v471_v12  ;;  %4601 = vmatprep.subr.bf16.mxu0 %v4600_v7 }
 0x199   :  { %4603 = vmatpush1.bf16.msra.mxu0 %v4602_v63 }
 0x19a   :  { %v475_v39 = vpop.f32.mrb[34].mxu0  ;;  %v6294_v46 = vpop.f32.mrb[60].mxu1 }
 0x19b   :  { %v3407_v40 = vmul.f32 %v6210_v59, %v475_v39  ;;  %v477_v41 = vpop.f32.mrb[35].mxu0  ;;  %v6297_v24 = vpop.f32.mrb[61].mxu1 }
 0x19c   :  { %v3408_v9 = vmul.f32 %v6213_v26, %v477_v41 }
 0x19d   :  { %v4606_v10 = vpack.c.bf16 %v3407_v40, %v3405_v43 }
 0x19e   :  { %v4604_v49 = vpack.c.bf16 %v3408_v9, %v3406_v34  ;;  %v481_v15 = vpop.f32.mrb[36].mxu0  ;;  %v6300_v17 = vpop.f32.mrb[62].mxu1 }
 0x19f   :  { %v3409_v29 = vmul.f32 %v6216_v60, %v481_v15  ;;  %v483_v16 = vpop.f32.mrb[37].mxu0  ;;  %v6303_v48 = vpop.f32.mrb[63].mxu1 }
 0x1a0   :  { %v3410_v11 = vmul.f32 %v6219_v25, %v483_v16  ;;  %4605 = vmatprep.subr.bf16.mxu0 %v4604_v49 }
 0x1a1   :  { %4607 = vmatpush1.bf16.msra.mxu0 %v4606_v10 }
 0x1a2   :  { %v487_v59 = vpop.f32.mrb[38].mxu0 }
 0x1a3   :  { %v3411_v22 = vmul.f32 %v6224_v28, %v487_v59  ;;  %v489_v26 = vpop.f32.mrb[39].mxu0 }
 0x1a4   :  { %v3412_v63 = vmul.f32 %v6227_v52, %v489_v26 }
 0x1a5   :  { %v4610_v7 = vpack.c.bf16 %v3411_v22, %v3409_v29 }
 0x1a6   :  { %v4608_v23 = vpack.c.bf16 %v3412_v63, %v3410_v11  ;;  %v493_v43 = vpop.f32.mrb[40].mxu0 }
 0x1a7   :  { %v3413_v60 = vmul.f32 %v6232_v5, %v493_v43  ;;  %v495_v12 = vpop.f32.mrb[41].mxu0 }
 0x1a8   :  { %v3414_v34 = vmul.f32 %v6235_v32, %v495_v12  ;;  %4609 = vmatprep.subr.bf16.mxu0 %v4608_v23 }
 0x1a9   :  { %4611 = vmatpush1.bf16.msra.mxu0 %v4610_v7 }
 0x1aa   :  { %v499_v25 = vpop.f32.mrb[42].mxu0 }
 0x1ab   :  { %v3415_v39 = vmul.f32 %v6240_v1, %v499_v25  ;;  %v501_v40 = vpop.f32.mrb[43].mxu0  ;;  %v6311_v9 = vpop.trf.xlu1 }
 0x1ac   :  { %v3416_v41 = vmul.f32 %v6243_v13, %v501_v40  ;;  %v4707_v5 = vunpack.i.l.bf16 %v6311_v9 }
 0x1ad   :  { %v4614_v28 = vpack.c.bf16 %v3415_v39, %v3413_v60 }
 0x1ae   :  { %v4612_v52 = vpack.c.bf16 %v3416_v41, %v3414_v34  ;;  %v505_v10 = vpop.f32.mrb[44].mxu0  ;;  %3565 = vmatprep.mubr.f32.mxu0 %v4707_v5 }
 0x1af   :  { %v3417_v49 = vmul.f32 %v6246_v62, %v505_v10  ;;  %v507_v15 = vpop.f32.mrb[45].mxu0  ;;  %v6316_v29 = vpop.trf.xlu1 }
 0x1b0   :  { %v3418_v32 = vmul.f32 %v6249_v55, %v507_v15  ;;  %4613 = vmatprep.subr.bf16.mxu0 %v4612_v52 }
 0x1b1   :  { %4615 = vmatpush1.bf16.msra.mxu0 %v4614_v28 }
 0x1b2   :  { %v511_v1 = vpop.f32.mrb[46].mxu0 }
 0x1b3   :  { %v3419_v13 = vmul.f32 %v6252_v14, %v511_v1  ;;  %v513_v16 = vpop.f32.mrb[47].mxu0 }
 0x1b4   :  { %v3420_v11 = vmul.f32 %v6255_v2, %v513_v16 }
 0x1b5   :  { %v4618_v59 = vpack.c.bf16 %v3419_v13, %v3417_v49 }
 0x1b6   :  { %v4616_v22 = vpack.c.bf16 %v3420_v11, %v3418_v32  ;;  %v517_v26 = vpop.f32.mrb[48].mxu0 }
 0x1b7   :  { %v3421_v62 = vmul.f32 %v6258_v19, %v517_v26  ;;  %v519_v63 = vpop.f32.mrb[49].mxu0  ;;  %v4710_v26 = vunpack.i.h.bf16 %v6311_v9 }
 0x1b8   :  { %v3422_v7 = vmul.f32 %v6261_v57, %v519_v63  ;;  %4617 = vmatprep.subr.bf16.mxu0 %v4616_v22 }
 0x1b9   :  { %4619 = vmatpush1.bf16.msra.mxu0 %v4618_v59 }
 0x1ba   :  { %v523_v55 = vpop.f32.mrb[50].mxu0 }
 0x1bb   :  { %v3423_v23 = vmul.f32 %v6264_v45, %v523_v55  ;;  %v525_v43 = vpop.f32.mrb[51].mxu0  ;;  %v6553_v55 = vld [vmem:[#allocation17_spill] sm:$0xff] }
 0x1bc   :  { %v3424_v60 = vmul.f32 %v6267_v21, %v525_v43  ;;  %v6555_v43 = vld [vmem:[#allocation27_spill] sm:$0xff] }
 0x1bd   :  { %v4622_v14 = vpack.c.bf16 %v3423_v23, %v3421_v62 }
 0x1be   :  { %v4620_v12 = vpack.c.bf16 %v3424_v60, %v3422_v7  ;;  %v529_v34 = vpop.f32.mrb[52].mxu0  ;;  %v6552_v7 = vld [vmem:[#allocation19_spill] sm:$0xff] }
 0x1bf   :  { %v3425_v2 = vmul.f32 %v6270_v38, %v529_v34  ;;  %v531_v25 = vpop.f32.mrb[53].mxu0  ;;  %v6554_v23 = vpack.c.bf16 %v6552_v7, %v6553_v55  ;;  %v6560_v34 = vld [vmem:[#allocation30_spill] sm:$0xff] }
 0x1c0   :  { %v3426_v39 = vmul.f32 %v6273_v50, %v531_v25  ;;  %4621 = vmatprep.subr.bf16.mxu0 %v4620_v12 }
 0x1c1   :  { %4623 = vmatpush1.bf16.msra.mxu0 %v4622_v14  ;;  %v6557_v14 = vld [vmem:[#allocation22_spill] sm:$0xff] }
 0x1c2   :  { %v535_v19 = vpop.f32.mrb[54].mxu0 }
 0x1c3   :  { %v3427_v57 = vmul.f32 %v6276_v53, %v535_v19  ;;  %v537_v40 = vpop.f32.mrb[55].mxu0  ;;  %v6563_v19 = vld [vmem:[#allocation24_spill] sm:$0xff] }
 0x1c4   :  { %v3428_v41 = vmul.f32 %v6279_v18, %v537_v40  ;;  %v6565_v40 = vld [vmem:[#allocation31_spill] sm:$0xff] }
 0x1c5   :  { %v4626_v45 = vpack.c.bf16 %v3427_v57, %v3425_v2  ;;  %v6561_v2 = vld [vmem:[#allocation32_spill] sm:$0xff] }
 0x1c6   :  { %v4624_v28 = vpack.c.bf16 %v3428_v41, %v3426_v39  ;;  %v541_v52 = vpop.f32.mrb[56].mxu0  ;;  %v4652_v25 = vpack.c.bf16 %v6561_v2, %v6560_v34  ;;  %v6562_v39 = vld [vmem:[#allocation26_spill] sm:$0xff]  ;;  %v6566_v41 = vld [vmem:[#allocation29_spill] sm:$0xff] }
 0x1c7   :  { %v3429_v21 = vmul.f32 %v6282_v61, %v541_v52  ;;  %v543_v10 = vpop.f32.mrb[57].mxu0  ;;  %v6564_v57 = vpack.c.bf16 %v6562_v39, %v6563_v19  ;;  %v6569_v52 = vld [vmem:[#allocation33_spill] sm:$0xff] }
 0x1c8   :  { %v3430_v49 = vmul.f32 %v6285_v56, %v543_v10  ;;  %4625 = vmatprep.subr.bf16.mxu0 %v4624_v28  ;;  %v6568_v28 = vld [vmem:[#allocation8_spill] sm:$0xff]  ;;  %v6571_v10 = vld [vmem:[#allocation9_spill] sm:$0xff] }
 0x1c9   :  { %4627 = vmatpush1.bf16.msra.mxu0 %v4626_v45  ;;  %v6567_v45 = vpack.c.bf16 %v6565_v40, %v6566_v41 }
 0x1ca   :  { %v547_v38 = vpop.f32.mrb[58].mxu0 }
 0x1cb   :  { %v3431_v50 = vmul.f32 %v6288_v42, %v547_v38  ;;  %v549_v15 = vpop.f32.mrb[59].mxu0 }
 0x1cc   :  { %v3432_v5 = vmul.f32 %v6291_v54, %v549_v15  ;;  %v4636_v54 = vpack.c.bf16 %v5438_v20, %v5402_v6  ;;  %v6550_v6 = vld [vmem:[#allocation23_spill] sm:$0xff]  ;;  %v6551_v20 = vld [vmem:[#allocation25_spill] sm:$0xff] }
 0x1cd   :  { %v4630_v53 = vpack.c.bf16 %v3431_v50, %v3429_v21  ;;  %v4644_v9 = vpack.c.bf16 %v6551_v20, %v6550_v6  ;;  %v6570_v21 = vpack.c.bf16 %v6568_v28, %v6569_v52  ;;  %v6574_v15 = vld [vmem:[#allocation7_spill] sm:$0xff] }
 0x1ce   :  { %v4628_v32 = vpack.c.bf16 %v3432_v5, %v3430_v49  ;;  %v553_v1 = vpop.f32.mrb[60].mxu0  ;;  %v6572_v49 = vld [vmem:[#allocation11_spill] sm:$0xff] }
 0x1cf   :  { %v3433_v18 = vmul.f32 %v6294_v46, %v553_v1  ;;  %v555_v13 = vpop.f32.mrb[61].mxu0  ;;  %v4712_v46 = vunpack.i.l.bf16 %v6316_v29  ;;  %v6573_v38 = vpack.c.bf16 %v6571_v10, %v6572_v49  ;;  %v3744_v49 = vld [vmem:[%s6459_s1] sm:$0xff] }
 0x1d0   :  { %v3434_v16 = vmul.f32 %v6297_v24, %v555_v13  ;;  %4629 = vmatprep.subr.bf16.mxu0 %v4628_v32  ;;  %v6548_v24 = vld [vmem:[#allocation21_spill] sm:$0xff] }
 0x1d1   :  { %4631 = vmatpush1.bf16.msra.mxu0 %v4630_v53  ;;  %v4640_v62 = vpack.c.bf16 %v6548_v24, %v5499_v0  ;;  %v6556_v0 = vld [vmem:[#allocation28_spill] sm:$0xff] }
 0x1d2   :  { %v559_v61 = vpop.f32.mrb[62].mxu0  ;;  %v4648_v60 = vpack.c.bf16 %v6556_v0, %v6555_v43  ;;  %v6576_v43 = vld [vmem:[#allocation6_spill] sm:$0xff] }
 0x1d3   :  { %v3435_v56 = vmul.f32 %v6300_v17, %v559_v61  ;;  %v561_v11 = vpop.f32.mrb[63].mxu0  ;;  %v4715_v17 = vunpack.i.h.bf16 %v6316_v29  ;;  %v6558_v29 = vld [vmem:[#allocation20_spill] sm:$0xff]  ;;  %v3721_v0 = vadd.s32 4, %v6576_v43 }
 0x1d4   :  { %v3436_v59 = vmul.f32 %v6303_v48, %v561_v11  ;;  %v4745_v48 = vmov 1.0|1.0   ;;  %v6559_v12 = vpack.c.bf16 %v6557_v14, %v6558_v29 }
 0x1d5   :  { %v4634_v42 = vpack.c.bf16 %v3435_v56, %v3433_v18  ;;  %vm3722_vm8 = vcmp.eq.s32.totalorder %v4774_v4, %v3721_v0 }
 0x1d6   :  { %v4632_v22 = vpack.c.bf16 %v3436_v59, %v3434_v16 }
 0x1d8   :  { %4633 = vmatprep.subr.bf16.mxu0 %v4632_v22 }
 0x1d9   :  { %4635 = vmatpush1.bf16.msra.mxu0 %v4634_v42 }
 0x1da   :  { %4637 = vmatprep.subr.bf16.mxu0 %v4636_v54 }
 0x1dc   :  { %3566 = vmatmul.mubr.f32.vlgmr.msra.gmra.mrb[64].mxu0 %v4710_v26 }
 0x1dd   :  { %3571 = vmatprep.mubr.f32.mxu0 %v4712_v46  ;;  %4639 = vmatpush3.bf16.msk.msra.mxu0 %vm5473_vm3, %v4745_v48  ;;  %vm3654_vm3 = vcmp.eq.s32.totalorder %v6574_v15, 8  ;;  %v6392_v48 = vsel %vm3670_vm4, 1.0, %v6516_v35 }
 0x1de   :  { %4641 = vmatprep.subr.bf16.mxu0 %v4640_v62  ;;  %v4357_v44 = vsel %vm3654_vm3, 1.0, %v6516_v35  ;;  %vm3690_vm14 = vcmp.gt.f32.partialorder %v6392_v48, 0.0 }
 0x1e0   :  { %3572 = vmatmul.mubr.f32.gmra.mrb[66].mxu0 %v4715_v17 }
 0x1e1   :  { %4643 = vmatpush3.bf16.msra.mxu0 %v6554_v23 }
 0x1e2   :  { %4645 = vmatprep.subr.bf16.mxu0 %v4644_v9  ;;  %v4359_v9 = vsel %vm3675_vm7, 1.0, %v6516_v35 }
 0x1e3   :  { %vm3695_vm12 = vcmp.gt.f32.partialorder %v4359_v9, 0.0 }
 0x1e5   :  { %4647 = vmatpush3.bf16.msra.mxu0 %v6559_v12 }
 0x1e6   :  { %4649 = vmatprep.subr.bf16.mxu0 %v4648_v60  ;;  %v3723_v60 = vadd.s32 4, %v4774_v4 }
 0x1e8   :  { %vm3724_vm9 = vcmp.eq.s32.totalorder %v3723_v60, %v6576_v43 }
 0x1e9   :  { %4651 = vmatpush3.bf16.msra.mxu0 %v6564_v57  ;;  %vm3725_vm10 = vmor %vm3722_vm8, %vm3724_vm9 }
 0x1ea   :  { %4653 = vmatprep.subr.bf16.mxu0 %v4652_v25  ;;  %v4360_v34 = vsel %vm3725_vm10, 1.0, %v6516_v35 }
 0x1ed   :  { %4655 = vmatpush3.bf16.msra.mxu0 %v6567_v45 }
 0x1ee   :  { %4657 = vmatprep.subr.bf16.mxu0 %v4656_v47 }
 0x1f1   :  { %4659 = vmatpush3.bf16.msra.mxu0 %v6570_v21 }
 0x1f2   :  { %4661 = vmatprep.subr.bf16.mxu0 %v4660_v51 }
 0x1f5   :  { %4663 = vmatpush3.bf16.msra.mxu0 %v6573_v38 }
 0x1f6   :  { %4665 = vmatprep.subr.bf16.mxu0 %v4664_v3 }
 0x1f9   :  { %4667 = vmatpush3.bf16.msra.mxu0 %v4666_v58 }
 0x1fa   :  { %4509 = vmatprep.subr.mxu0 %v6516_v35 }
 0x2af   :  { %v3567_v8 = vpop.f32.mrb[64].mxu0 }
 0x2b0   :  { %v3569_v37 = vpop.f32.mrb[65].mxu0 }
 0x2b1   :  { %3642 = vmatprep.mubr.f32.mxu0 %v3569_v37  ;;  %v4366_v37 = vld [vmem:[%s6459_s1 + $0x10] sm:$0xff] }
 0x2b2   :  { %3643 = vmatmul.mubr.f32.vlgmr.msra.gmra.mrb[68].mxu0 %v3567_v8  ;;  %v4363_v8 = vld [vmem:[%s6459_s1 + $0x8] sm:$0xff] }
 0x2b3   :  { %v3573_v27 = vpop.f32.mrb[66].mxu0 }
 0x2b4   :  { %v3575_v33 = vpop.f32.mrb[67].mxu0 }
 0x2b5   :  { %3647 = vmatprep.mubr.f32.mxu0 %v3575_v33 }
 0x2b6   :  { %3648 = vmatmul.mubr.f32.gmra.mrb[70].mxu0 %v3573_v27 }
 0x2b7   :  { %4511 = vmatprep.mubr.msk.f32.mxu0 %vm4746_vm11, %v6516_v35 }
 0x385   :  { %v4497_v47 = vpop.f32.mrb[68].mxu0 }
 0x386   :  { %v4498_v51 = vpop.f32.mrb[69].mxu0 }
 0x387   :  { %v4499_v50 = vadd.f32 %v4498_v51, %v4497_v47 }
 0x389   :  { %v3705_v36 = vmul.f32 %v4499_v50, %v6575_v31  ;;  %v4500_v3 = vpop.f32.mrb[70].mxu0  ;;  %v3659_v58 = vmul.f32 0.0, %v4499_v50 }
 0x38a   :  { %v4501_v30 = vpop.f32.mrb[71].mxu0 }
 0x38b   :  { %v3706_v5 = vsel %vm210_vm5, %v3705_v36, 0.0  ;;  %v4502_v53 = vadd.f32 %v4501_v30, %v4500_v3  ;;  %v3661_v13 = vsel %vm956_vm0, %v3659_v58, 0.0 }
 0x38c   :  { %v3707_v32 = vrot.slane %v3706_v5, 4 }
 0x38d   :  { %v3660_v1 = vmul.f32 %v4502_v53, %v4357_v44  ;;  %v4365_v53 = vld [vmem:[%s6459_s1 + $0x20] sm:$0xff] }
 0x38e   :  { %v3708_v18 = vadd.f32 %v3707_v32, %v3706_v5 }
 0x38f   :  { %v3662_v16 = vsel %vm956_vm0, %v3660_v1, 0.0 }
 0x390   :  { %v3709_v61 = vrot.slane %v3708_v18, 2  ;;  %v3663_v56 = vadd.f32 %v3662_v16, %v3661_v13 }
 0x392   :  { %v3710_v11 = vadd.f32 %v3709_v61, %v3708_v18  ;;  %v3664_v59 = vrot.slane %v3663_v56, 4 }
 0x394   :  { %v3711_v42 = vrot.slane %v3710_v11, 1  ;;  %v3665_v22 = vadd.f32 %v3664_v59, %v3663_v56  ;;  %v4368_v56 = vld [vmem:[%s6459_s1 + $0x28] sm:$0xff] }
 0x396   :  { %v3712_v54 = vadd.f32 %v3711_v42, %v3710_v11  ;;  %v3666_v26 = vrot.slane %v3665_v22, 2 }
 0x398   :  { %4716 = vrsqrt.f32 %v3712_v54  ;;  %v3667_v46 = vadd.f32 %v3666_v26, %v3665_v22 }
 0x39a   :  { %v3668_v24 = vrot.slane %v3667_v46, 1 }
 0x39c   :  { %v3669_v62 = vadd.f32 %v3668_v24, %v3667_v46 }
 0x39e   :  { %v3678_v20 = vmul.f32 %v6392_v48, %v3669_v62  ;;  %v3684_v55 = vmul.f32 %v4359_v9, %v3669_v62 }
 0x3a0   :  { %v3679_v7 = vsel %vm956_vm0, %v3678_v20, 0.0  ;;  %v3685_v23 = vsel %vm956_vm0, %v3684_v55, 0.0 }
 0x3a2   :  { %v4717_v17 = vpop.eup %4716 }
 0x3a3   :  { %v3714_v63 = vmul.f32 %v4717_v17, %v6575_v31 }
 0x3a5   :  { %v3715_v6 = vsel %vm210_vm5, %v3714_v63, 0.0 }
 0x3a6   :  { %3716 = vadd.xlane.f32.xlu1 %v3715_v6 }
 0x3aa   :  { %3680 = vadd.xlane.f32.xlu1 %v3679_v7 }
 0x3ae   :  { %3686 = vadd.xlane.f32.xlu1 %v3685_v23 }
 0x433   :  { %v3717_v14 = vpop.xlane.xlu1 %3716 }
 0x434   :  { %v3718_v29 = vmul.f32 %v4499_v50, %v3717_v14 }
 0x436   :  { %v3719_v12 = vmul.f32 %v4717_v17, %v3718_v29 }
 0x437   :  { %v3681_v27 = vpop.xlane.xlu1 %3680 }
 0x438   :  { %v3720_v2 = vmul.f32 2.0, %v3719_v12 }
 0x43a   :  { %v3732_v25 = vsel %vm210_vm5, %v3720_v2, -inf  ;;  %v3728_v39 = vmul.f32 %v4360_v34, %v3720_v2 }
 0x43b   :  { %3733 = vmax.xlane.f32.xlu0 %v3732_v25  ;;  %v3687_v33 = vpop.xlane.xlu1 %3686 }
 0x43c   :  { %v3729_v19 = vsel %vm210_vm5, %v3728_v39, 0.0 }
 0x43d   :  { %3730 = vadd.xlane.f32.xlu1 %v3729_v19 }
 0x4c8   :  { %v3734_v4 = vpop.xlane.xlu0 %3733 }
 0x4c9   :  { %v3735_v57 = vrot.slane %v3734_v4, 4 }
 0x4ca   :  { %v3731_v17 = vpop.xlane.xlu1 %3730 }
 0x4cb   :  { %v3736_v40 = vmax.f32 %v3734_v4, %v3735_v57  ;;  %v4000_v0 = vrot.slane %v3731_v17, 4 }
 0x4cd   :  { %v3737_v41 = vrot.slane %v3736_v40, 2  ;;  %v4001_v60 = vadd.f32 %v4000_v0, %v3731_v17 }
 0x4cf   :  { %v3738_v45 = vmax.f32 %v3736_v40, %v3737_v41  ;;  %v4002_v29 = vrot.slane %v4001_v60, 2 }
 0x4d1   :  { %v3739_v28 = vrot.slane %v3738_v45, 1 }
 0x4d3   :  { %v6409_v52 = vmax.f32 %v3738_v45, %v3739_v28 }
 0x4d5   :  { %v3741_v21 = vsub.f32 %v3720_v2, %v6409_v52  ;;  %v3988_v48 = vsub.f32 %v3731_v17, %v6409_v52  ;;  %v4003_v2 = vadd.f32 %v4002_v29, %v4001_v60 }
 0x4d7   :  { %v3742_v10 = vmul.f32 1.442695, %v3741_v21  ;;  %v3989_v63 = vmul.f32 1.442695, %v3988_v48  ;;  %v4004_v19 = vrot.slane %v4003_v2, 1 }
 0x4d9   :  { %4718 = vpow2.f32 %v3742_v10  ;;  %v4005_v41 = vadd.f32 %v4004_v19, %v4003_v2 }
 0x4da   :  { %4720 = vrcp.f32 %v3687_v33 }
 0x4db   :  { %4722 = vrcp.f32 %v3681_v27 }
 0x4e3   :  { %v4719_v38 = vpop.eup %4718 }
 0x4e4   :  { %4510 = vmatpush3.msra.mxu0 %v4719_v38  ;;  %v4721_v47 = vpop.eup %4720 }
 0x4e5   :  { %4512 = vmatmul.mubr.msk.f32.vlgmr.msra.gmra.mrb[72].mxu0 %vm210_vm5, %v3744_v49  ;;  %4514 = vmatprep.subr.mxu0 %v6516_v35  ;;  %v4723_v51 = vpop.eup %4722  ;;  %v3689_v50 = vmul.f32 %v4721_v47, %v3684_v55 }
 0x4e6   :  { %4515 = vmatpush3.msra.mxu0 %v4719_v38  ;;  %4516 = vmatprep.mubr.msk.f32.mxu0 %vm4746_vm11, %v6516_v35  ;;  %v3683_v15 = vmul.f32 %v4723_v51, %v3678_v20 }
 0x4e7   :  { %4519 = vmatprep.subr.mxu0 %v6516_v35  ;;  %v3696_v31 = vsel %vm3695_vm12, %v3689_v50, 1.0 }
 0x4e8   :  { %v3691_v36 = vsel %vm3690_vm14, %v3683_v15, 1.0  ;;  %4724 = vlog2.f32 %v3696_v31 }
 0x4e9   :  { %4517 = vmatmul.mubr.msk.f32.vlgmr.msra.gmra.mrb[74].mxu0 %vm210_vm5, %v4363_v8  ;;  %4726 = vlog2.f32 %v3691_v36 }
 0x4ea   :  { %4520 = vmatpush3.msra.mxu0 %v4719_v38  ;;  %4521 = vmatprep.mubr.msk.f32.mxu0 %vm4746_vm11, %v6516_v35  ;;  %v4362_v35 = vld [vmem:[%s6459_s1 + $0x18] sm:$0xff]  ;;  %4728 = vpow2.f32 %v3989_v63 }
 0x4ed   :  { %4522 = vmatmul.mubr.msk.f32.vlgmr.msra.gmra.mrb[76].mxu0 %vm210_vm5, %v4366_v37 }
 0x4f2   :  { %v4725_v3 = vpop.eup %4724 }
 0x4f3   :  { %v4727_v5 = vpop.eup %4726  ;;  %v3698_v1 = vmul.f32 0.6931472, %v4725_v3 }
 0x4f4   :  { %v3693_v61 = vmul.f32 0.6931472, %v4727_v5  ;;  %v4729_v23 = vpop.eup %4728 }
 0x4f5   :  { %v3699_v59 = vmul.f32 %v3698_v1, %v3689_v50 }
 0x4f6   :  { %v3694_v26 = vmul.f32 %v3693_v61, %v3683_v15 }
 0x4f8   :  { %v3700_v24 = vadd.f32 %v3699_v59, %v3694_v26 }
 0x4fa   :  { %v3701_v62 = vsel %vm956_vm0, %v3700_v24, 0.0 }
 0x5b8   :  { %v3814_v30 = vpop.f32.mrb[72].mxu0 }
 0x5b9   :  { %v3820_v44 = vmul.f32 %v4362_v35, %v3814_v30  ;;  %v4513_v58 = vpop.f32.mrb[73].mxu0 }
 0x5bb   :  { %v3821_v32 = vsel %vm210_vm5, %v3820_v44, 0.0 }
 0x5bc   :  { %v3895_v18 = vpop.f32.mrb[74].mxu0  ;;  %3822 = vadd.xlane.f32.xlu1 %v3821_v32 }
 0x5bd   :  { %v3901_v13 = vmul.f32 %v4365_v53, %v3895_v18  ;;  %v4518_v16 = vpop.f32.mrb[75].mxu0 }
 0x5bf   :  { %v3902_v11 = vsel %vm210_vm5, %v3901_v13, 0.0 }
 0x5c0   :  { %v3977_v42 = vpop.f32.mrb[76].mxu0  ;;  %3903 = vadd.xlane.f32.xlu1 %v3902_v11 }
 0x5c1   :  { %v3983_v22 = vmul.f32 %v4368_v56, %v3977_v42  ;;  %v4523_v54 = vpop.f32.mrb[77].mxu0 }
 0x5c3   :  { %v3984_v46 = vsel %vm210_vm5, %v3983_v22, 0.0 }
 0x5c4   :  { %3985 = vadd.xlane.f32.xlu1 %v3984_v46 }
 0x5c8   :  { %3702 = vadd.xlane.f32.xlu1 %v3701_v62 }
 0x649   :  { %v3823_v6 = vpop.xlane.xlu1 %3822 }
 0x64d   :  { %v3904_v20 = vpop.xlane.xlu1 %3903 }
 0x64e   :  { %v3905_v9 = vadd.f32 %v3904_v20, %v3823_v6 }
 0x651   :  { %v3986_v7 = vpop.xlane.xlu1 %3985 }
 0x652   :  { %v3987_v55 = vadd.f32 %v3986_v7, %v3905_v9 }
 0x654   :  { %v3991_v43 = vadd.f32 %v4729_v23, %v3987_v55 }
 0x655   :  { %v3703_v28 = vpop.xlane.xlu1 %3702 }
 0x656   :  { %4730 = vlog2.f32 %v3991_v43  ;;  %v3704_v10 = vadd.f32 2.7725887, %v3703_v28 }
 0x660   :  { %v4731_v14 = vpop.eup %4730 }
 0x661   :  { %v3993_v12 = vmul.f32 0.6931472, %v4731_v14 }
 0x663   :  { %v3994_v34 = vrot.slane %v3993_v12, 4 }
 0x665   :  { %v3995_v25 = vadd.f32 %v3994_v34, %v3993_v12 }
 0x667   :  { %v3996_v39 = vrot.slane %v3995_v25, 2 }
 0x669   :  { %v3997_v4 = vadd.f32 %v3996_v39, %v3995_v25 }
 0x66b   :  { %v3998_v57 = vrot.slane %v3997_v4, 1 }
 0x66d   :  { %v3999_v40 = vadd.f32 %v3998_v57, %v3997_v4 }
 0x66f   :  { %v4006_v45 = vsub.f32 %v3999_v40, %v4005_v41 }
 0x671   :  { %v4008_v21 = vmul.f32 0.125, %v4006_v45 }
 0x673   :  { %v4009_v49 = vadd.f32 %v4008_v21, %v6409_v52 }
 0x675   :  { %v4010_v38 = vadd.f32 %v4009_v49, %v3704_v10 }
 0x677   :  { %4668 = vpush %v4010_v38 }
 0x6a8   :  { %s4669_s1 = spop %4668 }
 0x6a9   :  { %4013 = sst [smem:[#allocation3]] %s4669_s1 }
 0x6aa   :  { %4741 = shalt.err (!%p4738_p2)
}
 0x6ab   :  { %s4747_s3 = smov [#allocation3]  }
 0x6ac   :  { %4021 = dma.smem_to_hbm %s4747_s3, 16, %s6460_s2, [#allocation4]  }
 0x6ad   :  { %4742 = dma.done.wait [#allocation4], 16  }
 0x6ae   :  { %4743 = vsyncadd [#allocation4], 4294967280 }
 0x6af   :  { %4025 = sfence }
 0x6b0   :  { %4026 = vsyncpa [#allocation4], 1 }

</bundles_post_ra>
